<compile_context>
chip_gen: v7x
topology: tpu7x:2x2x1
jax: 0.10.0
libtpu: 0.0.40
codegen_flags: <defaults>
</compile_context>

<pallas_src>
import jax
import jax.numpy as jnp
import numpy as np
from jax.experimental import pallas as pl
from jax.experimental.pallas import tpu as pltpu

candidate_Cs = [8, 16, 24, 32, 40, 48, 56, 64]
BN_EPS = 1e-5


def _infer_cell_kernel(x_ref, wa_ref, ba_ref, w4_ref, b4_ref, o_ref, xpad, n1pad):
    """Whole InferCell for one batch element; intermediates stay resident in VMEM.

    x_ref:  (1, H, W, Cin)       input activations (NHWC)
    wa_ref: (9*Cin, 2*Cout)      [L0 3x3 | merged (L1 1x1 + FactorizedReduce) at centre tap], BN folded
    ba_ref: (1, 2*Cout)          folded bias+BN shift for the two x-edges
    w4_ref: (9*Cout, Cout)       L4 3x3 (node1 -> node3), BN folded
    b4_ref: (1, Cout)            folded bias+BN shift for L4
    o_ref:  (1, H*W, Cout)       node3 (reshaped back to NHWC in the wrapper)
    xpad:   VMEM (1, H+2, W+2, Cin)   scratch: zero-padded relu(x)
    n1pad:  VMEM (1, H+2, W+2, Cout)  scratch: zero-padded relu(node1)
    """
    _, H, W, Cin = x_ref.shape
    Cout = b4_ref.shape[-1]

    # pad(relu(x)) into VMEM scratch (zero padding commutes with ReLU since relu(0) == 0).
    xpad[...] = jnp.zeros_like(xpad)
    xpad[:, 1:H + 1, 1:W + 1, :] = jnp.maximum(x_ref[...], 0.0)

    # im2col over relu(x); tap order (kh, kw, cin) matches the host weight flattening.
    cols = [xpad[:, kh:kh + H, kw:kw + W, :] for kh in range(3) for kw in range(3)]
    patch = jnp.concatenate(cols, axis=-1).reshape(H * W, 9 * Cin)
    # ONE MXU matmul covers every edge that consumes node0.
    ya = jnp.dot(patch, wa_ref[...], preferred_element_type=jnp.float32) + ba_ref[...]
    node1 = ya[:, :Cout]            # layer 0: nor_conv_3x3(node0)
    xedge = ya[:, Cout:]            # merged nor_conv_1x1(node0) + FactorizedReduce(node0)

    # pad(relu(node1)) for the second 3x3 — node1 never leaves VMEM.
    n1pad[...] = jnp.zeros_like(n1pad)
    n1pad[:, 1:H + 1, 1:W + 1, :] = jnp.maximum(node1, 0.0).reshape(1, H, W, Cout)

    cols = [n1pad[:, kh:kh + H, kw:kw + W, :] for kh in range(3) for kw in range(3)]
    patch = jnp.concatenate(cols, axis=-1).reshape(H * W, 9 * Cout)
    y4 = jnp.dot(patch, w4_ref[...], preferred_element_type=jnp.float32) + b4_ref[...]

    # node2 = L1(x) + node1 ; tmp = FR(x) + node2 ; node3 = L4(node1) + tmp
    #       => node3 = L4(node1) + node1 + (L1(x) + FR(x))
    node3 = y4 + node1 + xedge
    o_ref[...] = node3.reshape(1, H * W, Cout)


def infer_cell_forward(x, cell_params):
    """Fused InferCell forward. x: (N, H, W, Cin) NHWC -> node3: (N, H, W, Cout)."""
    wa, ba, w4, b4 = cell_params
    N, H, W, Cin = x.shape
    Cout = b4.shape[-1]
    K0 = 9 * Cin
    K4 = 9 * Cout

    flops = 2 * N * H * W * (K0 * 2 * Cout + K4 * Cout)
    bytes_accessed = 4 * (x.size + wa.size + ba.size + w4.size + b4.size + N * H * W * Cout)

    out = pl.pallas_call(
        _infer_cell_kernel,
        out_shape=jax.ShapeDtypeStruct((N, H * W, Cout), jnp.float32),
        grid_spec=pltpu.PrefetchScalarGridSpec(
            num_scalar_prefetch=0,
            grid=(N,),                                    # batch axis; parallel -> 2 TCs on v7x
            in_specs=[
                pl.BlockSpec((1, H, W, Cin), lambda n: (n, 0, 0, 0)),
                pl.BlockSpec((K0, 2 * Cout), lambda n: (0, 0)),
                pl.BlockSpec((1, 2 * Cout), lambda n: (0, 0)),
                pl.BlockSpec((K4, Cout), lambda n: (0, 0)),
                pl.BlockSpec((1, Cout), lambda n: (0, 0)),
            ],
            out_specs=pl.BlockSpec((1, H * W, Cout), lambda n: (n, 0, 0)),
            scratch_shapes=[
                pltpu.VMEM((1, H + 2, W + 2, Cin), jnp.float32),
                pltpu.VMEM((1, H + 2, W + 2, Cout), jnp.float32),
            ],
        ),
        compiler_params=pltpu.CompilerParams(
            dimension_semantics=("parallel",),
        ),
        cost_estimate=pl.CostEstimate(
            flops=flops, transcendentals=0, bytes_accessed=bytes_accessed),
    )(x, wa, ba, w4, b4)
    return out.reshape(N, H, W, Cout)


# ---------------- host-side parameter construction / folding ----------------
def make_op_params(key, kh, kw, cin, cout):
    """Deterministic init of one ReLU-Conv-BN op (SlimmableConv2d slice + its BN[out_idx])."""
    kw_, kb_, kg_, kbeta_ = jax.random.split(key, 4)
    w = 0.1 * jax.random.normal(kw_, (kh, kw, cin, cout), jnp.float32)   # HWIO
    b = 0.1 * jax.random.normal(kb_, (cout,), jnp.float32)               # bias (affine=False -> bias=True)
    gamma = 1.0 + 0.1 * jax.random.normal(kg_, (cout,), jnp.float32)
    beta = 0.1 * jax.random.normal(kbeta_, (cout,), jnp.float32)
    running_mean = jnp.zeros((cout,), jnp.float32)
    running_var = jnp.ones((cout,), jnp.float32)
    # TODO(synk): BatchNorm is evaluated in inference mode with running stats;
    # training-mode batch statistics are not replicated.
    scale = gamma / jnp.sqrt(running_var + BN_EPS)
    shift = beta - running_mean * scale
    return (w, b, scale, shift)


def fold_cell_params(params):
    """Exact host-side algebra: BN folding + 1x1 edge merging + im2col weight flattening."""
    def fold(w, b, scale, shift):
        return w * scale[None, None, None, :], b * scale + shift

    w0, b0 = fold(*params['L0'])     # 3x3 Cin->Cout   (layer 0)
    w1, b1 = fold(*params['L1'])     # 1x1 Cin->Cout   (layer 1)
    wfr, bfr = fold(*params['FR'])   # 1x1 Cin->Cout   (FactorizedReduce, stride 1)
    w4, b4 = fold(*params['L4'])     # 3x3 Cout->Cout  (layer 4)

    kh, kw, cin, cout = w0.shape
    # merged 1x1: nor_conv_1x1 + FactorizedReduce (both consume relu(x), both summed into node3)
    wm = (w1 + wfr).reshape(cin, cout)
    bm = b1 + bfr

    # combined x-edge weight: [ L0 3x3 | merged 1x1 embedded at the centre tap ]
    wa = jnp.zeros((kh * kw * cin, 2 * cout), jnp.float32)
    wa = wa.at[:, :cout].set(w0.reshape(kh * kw * cin, cout))
    centre = (kh // 2) * kw + (kw // 2)
    wa = wa.at[centre * cin:(centre + 1) * cin, cout:].set(wm)
    ba = jnp.concatenate([b0, bm]).reshape(1, 2 * cout)

    w4f = w4.reshape(kh * kw * cout, cout)
    b4f = b4.reshape(1, cout)
    return (wa, ba, w4f, b4f)


# ---------------- pure-JAX reference (unfolded params; validates all the algebra) ----------------
def _ref_op(x, w, b, scale, shift, res, padding):
    y = jnp.maximum(x, 0.0)
    y = jax.lax.conv_general_dilated(
        y, w, window_strides=(1, 1),
        padding=((padding, padding), (padding, padding)),
        dimension_numbers=('NHWC', 'HWIO', 'NHWC'))
    y = y + b[None, None, None, :]
    y = y * scale[None, None, None, :] + shift[None, None, None, :]
    return y + res


def infer_cell_reference(x, params):
    N, H, W, _ = x.shape
    Cout = params['L0'][0].shape[-1]
    zeros = jnp.zeros((N, H, W, Cout), jnp.float32)
    node1 = _ref_op(x, *params['L0'], zeros, 1)
    node2 = _ref_op(x, *params['L1'], node1, 0)
    tmp = _ref_op(x, *params['FR'], node2, 0)
    node3 = _ref_op(node1, *params['L4'], tmp, 1)
    return node3


if __name__ == "__main__":
    key = jax.random.PRNGKey(0)
    k_x, k0, k1, kfr, k4 = jax.random.split(key, 5)

    in_idx, out_idx = 0, 1
    C_in = candidate_Cs[in_idx]    # 8
    C_out = candidate_Cs[out_idx]  # 16
    N, H, W = 2, 8, 8

    x_nchw = jax.random.normal(k_x, (N, C_in, H, W), jnp.float32)  # PyTorch layout
    x = jnp.transpose(x_nchw, (0, 2, 3, 1))                        # -> NHWC for the kernel

    params = {
        'L0': make_op_params(k0, 3, 3, C_in, C_out),   # nor_conv_3x3, node1 <- node0
        'L1': make_op_params(k1, 1, 1, C_in, C_out),   # nor_conv_1x1, node2 <- node0
        'FR': make_op_params(kfr, 1, 1, C_in, C_out),  # FactorizedReduce (layer 3, in_idx != out_idx)
        'L4': make_op_params(k4, 3, 3, C_out, C_out),  # nor_conv_3x3, node3 <- node1
    }
    cell_params = fold_cell_params(params)

    out = jax.block_until_ready(infer_cell_forward(x, cell_params))
    ref = infer_cell_reference(x, params)
    np.testing.assert_allclose(np.asarray(out), np.asarray(ref), rtol=2e-2, atol=2e-2)

    print("KERNEL_OK")
</pallas_src>

<mosaic_0001>
module attributes {stable_mosaic.version = 11 : i64} {
  func.func @_infer_cell_kernel(%arg0: i32, %arg1: memref<1x8x8x8xf32, #tpu.memory_space<vmem>>, %arg2: memref<72x32xf32, #tpu.memory_space<vmem>>, %arg3: memref<1x32xf32, #tpu.memory_space<vmem>>, %arg4: memref<144x16xf32, #tpu.memory_space<vmem>>, %arg5: memref<1x16xf32, #tpu.memory_space<vmem>>, %arg6: memref<1x64x16xf32, #tpu.memory_space<vmem>>, %arg7: memref<1x10x10x8xf32, #tpu.memory_space<vmem>>, %arg8: memref<1x10x10x16xf32, #tpu.memory_space<vmem>>) attributes {dimension_semantics = [#tpu.dimension_semantics<parallel>], iteration_bounds = array<i64: 2>, scalar_prefetch = 0 : i64, scratch_operands = 2 : i64, tpu.core_type = #tpu.core_type<tc>, window_params = [{transform_indices = @transform_0, window_bounds = array<i64: 1, 8, 8, 8>}, {pipeline_mode = #tpu.pipeline_mode<synchronous>, transform_indices = @transform_1, window_bounds = array<i64: 72, 32>}, {pipeline_mode = #tpu.pipeline_mode<synchronous>, transform_indices = @transform_2, window_bounds = array<i64: 1, 32>}, {pipeline_mode = #tpu.pipeline_mode<synchronous>, transform_indices = @transform_3, window_bounds = array<i64: 144, 16>}, {pipeline_mode = #tpu.pipeline_mode<synchronous>, transform_indices = @transform_4, window_bounds = array<i64: 1, 16>}, {transform_indices = @transform_5, window_bounds = array<i64: 1, 64, 16>}]} {
    %cst = arith.constant 0.000000e+00 : f32
    %0 = vector.broadcast %cst : f32 to vector<1x10x10x8xf32>
    %c0 = arith.constant 0 : index
    %c0_0 = arith.constant 0 : index
    %c0_1 = arith.constant 0 : index
    %c0_2 = arith.constant 0 : index
    %1 = vector.load %arg7[%c0, %c0_0, %c0_1, %c0_2] : memref<1x10x10x8xf32, #tpu.memory_space<vmem>>, vector<1x10x10x8xf32>
    tpu.vector_store %arg7[%c0, %c0_0, %c0_1, %c0_2], %0 {strides = array<i32>} : memref<1x10x10x8xf32, #tpu.memory_space<vmem>>, vector<1x10x10x8xf32>,
    %c0_3 = arith.constant 0 : index
    %c0_4 = arith.constant 0 : index
    %c0_5 = arith.constant 0 : index
    %c0_6 = arith.constant 0 : index
    %2 = vector.load %arg1[%c0_3, %c0_4, %c0_5, %c0_6] : memref<1x8x8x8xf32, #tpu.memory_space<vmem>>, vector<1x8x8x8xf32>
    %cst_7 = arith.constant 0.000000e+00 : f32
    %3 = vector.broadcast %cst_7 : f32 to vector<1x8x8x8xf32>
    %4 = arith.maximumf %2, %3 : vector<1x8x8x8xf32>
    %c0_8 = arith.constant 0 : index
    %c1 = arith.constant 1 : index
    %c1_9 = arith.constant 1 : index
    %c0_10 = arith.constant 0 : index
    %5 = vector.load %arg7[%c0_8, %c1, %c1_9, %c0_10] : memref<1x10x10x8xf32, #tpu.memory_space<vmem>>, vector<1x8x8x8xf32>
    tpu.vector_store %arg7[%c0_8, %c1, %c1_9, %c0_10], %4 {strides = array<i32>} : memref<1x10x10x8xf32, #tpu.memory_space<vmem>>, vector<1x8x8x8xf32>,
    %c0_11 = arith.constant 0 : index
    %c0_12 = arith.constant 0 : index
    %c0_13 = arith.constant 0 : index
    %c0_14 = arith.constant 0 : index
    %6 = vector.load %arg7[%c0_11, %c0_12, %c0_13, %c0_14] : memref<1x10x10x8xf32, #tpu.memory_space<vmem>>, vector<1x8x8x8xf32>
    %c0_15 = arith.constant 0 : index
    %c0_16 = arith.constant 0 : index
    %c1_17 = arith.constant 1 : index
    %c0_18 = arith.constant 0 : index
    %7 = vector.load %arg7[%c0_15, %c0_16, %c1_17, %c0_18] : memref<1x10x10x8xf32, #tpu.memory_space<vmem>>, vector<1x8x8x8xf32>
    %c0_19 = arith.constant 0 : index
    %c0_20 = arith.constant 0 : index
    %c2 = arith.constant 2 : index
    %c0_21 = arith.constant 0 : index
    %8 = vector.load %arg7[%c0_19, %c0_20, %c2, %c0_21] : memref<1x10x10x8xf32, #tpu.memory_space<vmem>>, vector<1x8x8x8xf32>
    %c0_22 = arith.constant 0 : index
    %c1_23 = arith.constant 1 : index
    %c0_24 = arith.constant 0 : index
    %c0_25 = arith.constant 0 : index
    %9 = vector.load %arg7[%c0_22, %c1_23, %c0_24, %c0_25] : memref<1x10x10x8xf32, #tpu.memory_space<vmem>>, vector<1x8x8x8xf32>
    %c0_26 = arith.constant 0 : index
    %c1_27 = arith.constant 1 : index
    %c1_28 = arith.constant 1 : index
    %c0_29 = arith.constant 0 : index
    %10 = vector.load %arg7[%c0_26, %c1_27, %c1_28, %c0_29] : memref<1x10x10x8xf32, #tpu.memory_space<vmem>>, vector<1x8x8x8xf32>
    %c0_30 = arith.constant 0 : index
    %c1_31 = arith.constant 1 : index
    %c2_32 = arith.constant 2 : index
    %c0_33 = arith.constant 0 : index
    %11 = vector.load %arg7[%c0_30, %c1_31, %c2_32, %c0_33] : memref<1x10x10x8xf32, #tpu.memory_space<vmem>>, vector<1x8x8x8xf32>
    %c0_34 = arith.constant 0 : index
    %c2_35 = arith.constant 2 : index
    %c0_36 = arith.constant 0 : index
    %c0_37 = arith.constant 0 : index
    %12 = vector.load %arg7[%c0_34, %c2_35, %c0_36, %c0_37] : memref<1x10x10x8xf32, #tpu.memory_space<vmem>>, vector<1x8x8x8xf32>
    %c0_38 = arith.constant 0 : index
    %c2_39 = arith.constant 2 : index
    %c1_40 = arith.constant 1 : index
    %c0_41 = arith.constant 0 : index
    %13 = vector.load %arg7[%c0_38, %c2_39, %c1_40, %c0_41] : memref<1x10x10x8xf32, #tpu.memory_space<vmem>>, vector<1x8x8x8xf32>
    %c0_42 = arith.constant 0 : index
    %c2_43 = arith.constant 2 : index
    %c2_44 = arith.constant 2 : index
    %c0_45 = arith.constant 0 : index
    %14 = vector.load %arg7[%c0_42, %c2_43, %c2_44, %c0_45] : memref<1x10x10x8xf32, #tpu.memory_space<vmem>>, vector<1x8x8x8xf32>
    %15 = tpu.concatenate %6, %7, %8, %9, %10, %11, %12, %13, %14 in 3 : vector<1x8x8x8xf32>, vector<1x8x8x8xf32>, vector<1x8x8x8xf32>, vector<1x8x8x8xf32>, vector<1x8x8x8xf32>, vector<1x8x8x8xf32>, vector<1x8x8x8xf32>, vector<1x8x8x8xf32>, vector<1x8x8x8xf32> -> vector<1x8x8x72xf32>
    %16 = vector.shape_cast %15 : vector<1x8x8x72xf32> to vector<64x72xf32>
    %c0_46 = arith.constant 0 : index
    %c0_47 = arith.constant 0 : index
    %17 = vector.load %arg2[%c0_46, %c0_47] : memref<72x32xf32, #tpu.memory_space<vmem>>, vector<72x32xf32>
    %cst_48 = arith.constant dense<0.000000e+00> : vector<64x32xf32>
    %18 = tpu.matmul %16, %17, %cst_48 {dimension_numbers = #tpu.dot_dimension_numbers<[1], [0], [0], [1], [0, 0, 1, 1], [], []>} : vector<64x72xf32>, vector<72x32xf32>, vector<64x32xf32> -> vector<64x32xf32>
    %c0_49 = arith.constant 0 : index
    %c0_50 = arith.constant 0 : index
    %19 = vector.load %arg3[%c0_49, %c0_50] : memref<1x32xf32, #tpu.memory_space<vmem>>, vector<1x32xf32>
    %20 = vector.broadcast %19 : vector<1x32xf32> to vector<64x32xf32>
    %21 = arith.addf %18, %20 : vector<64x32xf32>
    %22 = vector.extract_strided_slice %21 {offsets = [0, 0], sizes = [64, 16], strides = [1, 1]} : vector<64x32xf32> to vector<64x16xf32>
    %23 = vector.extract_strided_slice %21 {offsets = [0, 16], sizes = [64, 16], strides = [1, 1]} : vector<64x32xf32> to vector<64x16xf32>
    %cst_51 = arith.constant 0.000000e+00 : f32
    %24 = vector.broadcast %cst_51 : f32 to vector<1x10x10x16xf32>
    %c0_52 = arith.constant 0 : index
    %c0_53 = arith.constant 0 : index
    %c0_54 = arith.constant 0 : index
    %c0_55 = arith.constant 0 : index
    %25 = vector.load %arg8[%c0_52, %c0_53, %c0_54, %c0_55] : memref<1x10x10x16xf32, #tpu.memory_space<vmem>>, vector<1x10x10x16xf32>
    tpu.vector_store %arg8[%c0_52, %c0_53, %c0_54, %c0_55], %24 {strides = array<i32>} : memref<1x10x10x16xf32, #tpu.memory_space<vmem>>, vector<1x10x10x16xf32>,
    %cst_56 = arith.constant 0.000000e+00 : f32
    %26 = vector.broadcast %cst_56 : f32 to vector<64x16xf32>
    %27 = arith.maximumf %22, %26 : vector<64x16xf32>
    %28 = vector.shape_cast %27 : vector<64x16xf32> to vector<1x8x8x16xf32>
    %c0_57 = arith.constant 0 : index
    %c1_58 = arith.constant 1 : index
    %c1_59 = arith.constant 1 : index
    %c0_60 = arith.constant 0 : index
    %29 = vector.load %arg8[%c0_57, %c1_58, %c1_59, %c0_60] : memref<1x10x10x16xf32, #tpu.memory_space<vmem>>, vector<1x8x8x16xf32>
    tpu.vector_store %arg8[%c0_57, %c1_58, %c1_59, %c0_60], %28 {strides = array<i32>} : memref<1x10x10x16xf32, #tpu.memory_space<vmem>>, vector<1x8x8x16xf32>,
    %c0_61 = arith.constant 0 : index
    %c0_62 = arith.constant 0 : index
    %c0_63 = arith.constant 0 : index
    %c0_64 = arith.constant 0 : index
    %30 = vector.load %arg8[%c0_61, %c0_62, %c0_63, %c0_64] : memref<1x10x10x16xf32, #tpu.memory_space<vmem>>, vector<1x8x8x16xf32>
    %c0_65 = arith.constant 0 : index
    %c0_66 = arith.constant 0 : index
    %c1_67 = arith.constant 1 : index
    %c0_68 = arith.constant 0 : index
    %31 = vector.load %arg8[%c0_65, %c0_66, %c1_67, %c0_68] : memref<1x10x10x16xf32, #tpu.memory_space<vmem>>, vector<1x8x8x16xf32>
    %c0_69 = arith.constant 0 : index
    %c0_70 = arith.constant 0 : index
    %c2_71 = arith.constant 2 : index
    %c0_72 = arith.constant 0 : index
    %32 = vector.load %arg8[%c0_69, %c0_70, %c2_71, %c0_72] : memref<1x10x10x16xf32, #tpu.memory_space<vmem>>, vector<1x8x8x16xf32>
    %c0_73 = arith.constant 0 : index
    %c1_74 = arith.constant 1 : index
    %c0_75 = arith.constant 0 : index
    %c0_76 = arith.constant 0 : index
    %33 = vector.load %arg8[%c0_73, %c1_74, %c0_75, %c0_76] : memref<1x10x10x16xf32, #tpu.memory_space<vmem>>, vector<1x8x8x16xf32>
    %c0_77 = arith.constant 0 : index
    %c1_78 = arith.constant 1 : index
    %c1_79 = arith.constant 1 : index
    %c0_80 = arith.constant 0 : index
    %34 = vector.load %arg8[%c0_77, %c1_78, %c1_79, %c0_80] : memref<1x10x10x16xf32, #tpu.memory_space<vmem>>, vector<1x8x8x16xf32>
    %c0_81 = arith.constant 0 : index
    %c1_82 = arith.constant 1 : index
    %c2_83 = arith.constant 2 : index
    %c0_84 = arith.constant 0 : index
    %35 = vector.load %arg8[%c0_81, %c1_82, %c2_83, %c0_84] : memref<1x10x10x16xf32, #tpu.memory_space<vmem>>, vector<1x8x8x16xf32>
    %c0_85 = arith.constant 0 : index
    %c2_86 = arith.constant 2 : index
    %c0_87 = arith.constant 0 : index
    %c0_88 = arith.constant 0 : index
    %36 = vector.load %arg8[%c0_85, %c2_86, %c0_87, %c0_88] : memref<1x10x10x16xf32, #tpu.memory_space<vmem>>, vector<1x8x8x16xf32>
    %c0_89 = arith.constant 0 : index
    %c2_90 = arith.constant 2 : index
    %c1_91 = arith.constant 1 : index
    %c0_92 = arith.constant 0 : index
    %37 = vector.load %arg8[%c0_89, %c2_90, %c1_91, %c0_92] : memref<1x10x10x16xf32, #tpu.memory_space<vmem>>, vector<1x8x8x16xf32>
    %c0_93 = arith.constant 0 : index
    %c2_94 = arith.constant 2 : index
    %c2_95 = arith.constant 2 : index
    %c0_96 = arith.constant 0 : index
    %38 = vector.load %arg8[%c0_93, %c2_94, %c2_95, %c0_96] : memref<1x10x10x16xf32, #tpu.memory_space<vmem>>, vector<1x8x8x16xf32>
    %39 = tpu.concatenate %30, %31, %32, %33, %34, %35, %36, %37, %38 in 3 : vector<1x8x8x16xf32>, vector<1x8x8x16xf32>, vector<1x8x8x16xf32>, vector<1x8x8x16xf32>, vector<1x8x8x16xf32>, vector<1x8x8x16xf32>, vector<1x8x8x16xf32>, vector<1x8x8x16xf32>, vector<1x8x8x16xf32> -> vector<1x8x8x144xf32>
    %40 = vector.shape_cast %39 : vector<1x8x8x144xf32> to vector<64x144xf32>
    %c0_97 = arith.constant 0 : index
    %c0_98 = arith.constant 0 : index
    %41 = vector.load %arg4[%c0_97, %c0_98] : memref<144x16xf32, #tpu.memory_space<vmem>>, vector<144x16xf32>
    %cst_99 = arith.constant dense<0.000000e+00> : vector<64x16xf32>
    %42 = tpu.matmul %40, %41, %cst_99 {dimension_numbers = #tpu.dot_dimension_numbers<[1], [0], [0], [1], [0, 0, 1, 1], [], []>} : vector<64x144xf32>, vector<144x16xf32>, vector<64x16xf32> -> vector<64x16xf32>
    %c0_100 = arith.constant 0 : index
    %c0_101 = arith.constant 0 : index
    %43 = vector.load %arg5[%c0_100, %c0_101] : memref<1x16xf32, #tpu.memory_space<vmem>>, vector<1x16xf32>
    %44 = vector.broadcast %43 : vector<1x16xf32> to vector<64x16xf32>
    %45 = arith.addf %42, %44 : vector<64x16xf32>
    %46 = arith.addf %45, %22 : vector<64x16xf32>
    %47 = arith.addf %46, %23 : vector<64x16xf32>
    %48 = vector.shape_cast %47 : vector<64x16xf32> to vector<1x64x16xf32>
    %c0_102 = arith.constant 0 : index
    %c0_103 = arith.constant 0 : index
    %c0_104 = arith.constant 0 : index
    %49 = vector.load %arg6[%c0_102, %c0_103, %c0_104] : memref<1x64x16xf32, #tpu.memory_space<vmem>>, vector<1x64x16xf32>
    tpu.vector_store %arg6[%c0_102, %c0_103, %c0_104], %48 {strides = array<i32>} : memref<1x64x16xf32, #tpu.memory_space<vmem>>, vector<1x64x16xf32>,
    return
  }
  func.func @transform_0(%arg0: i32) -> (i32, i32, i32, i32) {
    %c0_i32 = arith.constant 0 : i32
    %c0_i32_0 = arith.constant 0 : i32
    %c0_i32_1 = arith.constant 0 : i32
    %c0_i32_2 = arith.constant 0 : i32
    return %arg0, %c0_i32, %c0_i32_0, %c0_i32_1 : i32, i32, i32, i32
  }
  func.func @transform_1(%arg0: i32) -> (i32, i32) {
    %c0_i32 = arith.constant 0 : i32
    %c0_i32_0 = arith.constant 0 : i32
    %c0_i32_1 = arith.constant 0 : i32
    return %c0_i32, %c0_i32_0 : i32, i32
  }
  func.func @transform_2(%arg0: i32) -> (i32, i32) {
    %c0_i32 = arith.constant 0 : i32
    %c0_i32_0 = arith.constant 0 : i32
    %c0_i32_1 = arith.constant 0 : i32
    return %c0_i32, %c0_i32_0 : i32, i32
  }
  func.func @transform_3(%arg0: i32) -> (i32, i32) {
    %c0_i32 = arith.constant 0 : i32
    %c0_i32_0 = arith.constant 0 : i32
    %c0_i32_1 = arith.constant 0 : i32
    return %c0_i32, %c0_i32_0 : i32, i32
  }
  func.func @transform_4(%arg0: i32) -> (i32, i32) {
    %c0_i32 = arith.constant 0 : i32
    %c0_i32_0 = arith.constant 0 : i32
    %c0_i32_1 = arith.constant 0 : i32
    return %c0_i32, %c0_i32_0 : i32, i32
  }
  func.func @transform_5(%arg0: i32) -> (i32, i32, i32) {
    %c0_i32 = arith.constant 0 : i32
    %c0_i32_0 = arith.constant 0 : i32
    %c0_i32_1 = arith.constant 0 : i32
    return %arg0, %c0_i32, %c0_i32_0 : i32, i32, i32
  }
}

</mosaic_0001>

<bundles_post_ra>
// kernel: tpu_custom_call.1
= control target key start
LH: loop header
LB: loop body
LE: loop exit
PB: predicated region body
PF: predicated region fallthrough
CT: control target
= control target key end

     0   :  { %s1828_s18 = smov 0   ;;  %s2461_s0 = inlined_call_operand.vmem [shape: f32[2,8,8,8], index: 0, kind: input, shape index: {}]   ;;  %s2462_s1 = inlined_call_operand.vmem [shape: f32[72,32], index: 1, kind: input, shape index: {}]   ;;  %s2463_s2 = inlined_call_operand.vmem [shape: f32[1,32], index: 2, kind: input, shape index: {}]   ;;  %s2464_s3 = inlined_call_operand.vmem [shape: f32[144,16], index: 3, kind: input, shape index: {}]   ;;  %s2465_s4 = inlined_call_operand.vmem [shape: f32[1,16], index: 4, kind: input, shape index: {}]   ;;  %s2466_s5 = inlined_call_operand.vmem [shape: f32[2,64,16], index: 5, kind: output, shape index: {}]  }
   0x1 LB: > { %s1477_s19 = sadd.s32 4294967295, %s1783_s18   ;;  %p1481_p0 = scmp.ge.s32.totalorder %s1783_s18, 1  ;;  %s1783_s18 = sphi %s1828_s18, %s15_s18  }
   0x2   : > { %p187_p1 = scmp.lt.s32.totalorder %s1783_s18, 3 }
   0x4   : > { %p188_p2 = pnand %p1481_p0, %p187_p1 }
   0x5   : > { %vm225_vm0 = vcmask (!%p188_p2), 64512   ;;  %vm227_vm1 = vcmask (!%p188_p2), 58368   ;;  %v1785_v0 = vmov (!%p188_p2), 0.0   ;;  %p215_p3 = scmp.lt.s32.totalorder (!%p188_p2), %s1477_s19, 1  ;;  %vm609_vm2 = vcmask (!%p188_p2), 130048   ;;  %s1786_s24 = smov (!%p188_p2), 16  }
   0x6   : > { %191 = sbr.rel (%p188_p2) target bundleno = 852 (0x354), region = 40  ;;  %226 = vst.msk [vmem:[#allocation2] sm:$0xff] (!%p188_p2), %vm225_vm0, %v1785_v0  ;;  %229 = vst.msk [vmem:[#allocation2 + $0x10] sm:$0xff] (!%p188_p2), %vm225_vm0, %v1785_v0  ;;  %s1787_s25 = smov (!%p188_p2), 8   ;;  %v672_v24 = vld [vmem:[%s2462_s1] sm:$0xff] (!%p188_p2)  ;;  %v673_v25 = vld [vmem:[%s2462_s1 + $0x8] sm:$0xff] (!%p188_p2) }
   0x7   : > { %228 = vst.msk [vmem:[#allocation2 + $0x8] sm:$0x3] (!%p188_p2), %vm227_vm1, %v1785_v0  ;;  %230 = vst.msk [vmem:[#allocation2 + $0x18] sm:$0x3] (!%p188_p2), %vm227_vm1, %v1785_v0  ;;  %s1788_s26 = smov (!%p188_p2), 24   ;;  %s1789_s6 = smov (!%p188_p2), 32   ;;  %v1555_v26 = vpack.c.bf16 (!%p188_p2), %v673_v25, %v672_v24 }
   0x8   : > { %231 = vst.msk [vmem:[#allocation2 + $0x20] sm:$0xff] (!%p188_p2), %vm225_vm0, %v1785_v0  ;;  %233 = vst.msk [vmem:[#allocation2 + $0x30] sm:$0xff] (!%p188_p2), %vm225_vm0, %v1785_v0  ;;  %v674_v27 = vld [vmem:[%s2462_s1 + $0x10] sm:$0xff] (!%p188_p2)  ;;  %v675_v28 = vld [vmem:[%s2462_s1 + $0x18] sm:$0xff] (!%p188_p2)  ;;  %s1790_s11 = smov (!%p188_p2), 40   ;;  %s1791_s16 = smov (!%p188_p2), 48  }
   0x9   : > { %232 = vst.msk [vmem:[#allocation2 + $0x28] sm:$0x3] (!%p188_p2), %vm227_vm1, %v1785_v0  ;;  %234 = vst.msk [vmem:[#allocation2 + $0x38] sm:$0x3] (!%p188_p2), %vm227_vm1, %v1785_v0  ;;  %1556 = vmatprep.subr.bf16.mxu0 (!%p188_p2), %v1555_v26  ;;  %v1559_v29 = vpack.c.bf16 (!%p188_p2), %v675_v28, %v674_v27  ;;  %v676_v31 = vld [vmem:[%s2462_s1 + $0x20] sm:$0xff] (!%p188_p2)  ;;  %v677_v32 = vld [vmem:[%s2462_s1 + $0x28] sm:$0xff] (!%p188_p2) }
   0xa   : > { %235 = vst.msk [vmem:[#allocation2 + $0x40] sm:$0xff] (!%p188_p2), %vm225_vm0, %v1785_v0  ;;  %237 = vst.msk [vmem:[#allocation2 + $0x50] sm:$0xff] (!%p188_p2), %vm225_vm0, %v1785_v0  ;;  %1558 = vmatpush3.bf16.msra.mxu0 (!%p188_p2), %v1555_v26  ;;  %v1563_v33 = vpack.c.bf16 (!%p188_p2), %v677_v32, %v676_v31  ;;  %v678_v35 = vld [vmem:[%s2462_s1 + $0x30] sm:$0xff] (!%p188_p2)  ;;  %v679_v36 = vld [vmem:[%s2462_s1 + $0x38] sm:$0xff] (!%p188_p2)  ;;  %s1792_s29 = smov (!%p188_p2), 56   ;;  %s1793_s30 = smov (!%p188_p2), 64  }
   0xb   : > { %236 = vst.msk [vmem:[#allocation2 + $0x48] sm:$0x3] (!%p188_p2), %vm227_vm1, %v1785_v0  ;;  %238 = vst.msk [vmem:[#allocation2 + $0x58] sm:$0x3] (!%p188_p2), %vm227_vm1, %v1785_v0  ;;  %1560 = vmatprep.subr.bf16.mxu0 (!%p188_p2), %v1559_v29  ;;  %v1567_v37 = vpack.c.bf16 (!%p188_p2), %v679_v36, %v678_v35  ;;  %v680_v39 = vld [vmem:[%s2462_s1 + $0x40] sm:$0xff] (!%p188_p2)  ;;  %vm618_vm3 = vcmask (!%p188_p2), 195584  }
   0xc   : > { %239 = vst.msk [vmem:[#allocation2 + $0x60] sm:$0xff] (!%p188_p2), %vm225_vm0, %v1785_v0  ;;  %241 = vst.msk [vmem:[#allocation2 + $0x70] sm:$0xff] (!%p188_p2), %vm225_vm0, %v1785_v0  ;;  %vm627_vm4 = vcmask (!%p188_p2), 261120   ;;  %vm636_vm5 = vcmask (!%p188_p2), 326656   ;;  %vm645_vm6 = vcmask (!%p188_p2), 392192   ;;  %vm654_vm7 = vcmask (!%p188_p2), 457728  }
   0xd   : > { %240 = vst.msk [vmem:[#allocation2 + $0x68] sm:$0x3] %vm227_vm1, %v1785_v0  ;;  %242 = vst.msk [vmem:[#allocation2 + $0x78] sm:$0x3] %vm227_vm1, %v1785_v0  ;;  %s2468_s19 = smov (!%p215_p3, %s1477_s19), 1  ;;  %vm663_vm8 = vcmask 523264  }
   0xe   : > { %243 = vst.msk [vmem:[#allocation2 + $0x80] sm:$0xff] %vm225_vm0, %v1785_v0  ;;  %245 = vst.msk [vmem:[#allocation2 + $0x90] sm:$0xff] %vm225_vm0, %v1785_v0  ;;  %s1506_s20 = sshll.u32 %s2468_s19, 6  ;;  %v288_v4 = vld [vmem:[#allocation2 + $0x2] sm:$0xff]  ;;  %1562 = vmatpush3.bf16.msra.mxu0 %v1559_v29  ;;  %vm688_vm9 = vcmask 588800   ;;  %vm819_vm10 = vcmask 123904  }
   0xf   : > { %244 = vst.msk [vmem:[#allocation2 + $0x88] sm:$0x3] %vm227_vm1, %v1785_v0  ;;  %246 = vst.msk [vmem:[#allocation2 + $0x98] sm:$0x3] %vm227_vm1, %v1785_v0  ;;  %s219_s23 = scalar_lea.vmem %s2461_s0, %s1506_s20  ;;  %v280_v5 = vld [vmem:[#allocation2 + $0x1] sm:$0xff]  ;;  %385 = vrot.lane.b32.xlu1 %v288_v4, %s1786_s24  ;;  %1564 = vmatprep.subr.bf16.mxu0 %v1563_v33  ;;  %s1795_s7 = smov 96  }
  0x10   : > { %818 = vst.msk [vmem:[#allocation3] sm:$0xff] %vm609_vm2, %v1785_v0  ;;  %821 = vst.msk [vmem:[#allocation3 + $0x10] sm:$0xff] %vm609_vm2, %v1785_v0  ;;  %v247_v1 = vld [vmem:[%s219_s23] sm:$0xff]  ;;  %v248_v2 = vld [vmem:[%s219_s23 + $0x8] sm:$0xff]  ;;  %353 = vrot.lane.b32.xlu0 %v280_v5, %s1787_s25  ;;  %s1796_s8 = smov 80   ;;  %s1797_s9 = smov 112  }
  0x11   : > { %823 = vst.msk [vmem:[#allocation3 + $0x20] sm:$0xff] %vm609_vm2, %v1785_v0  ;;  %825 = vst.msk [vmem:[#allocation3 + $0x30] sm:$0xff] %vm609_vm2, %v1785_v0  ;;  %v249_v3 = vld [vmem:[%s219_s23 + $0x10] sm:$0xff]  ;;  %v255_v6 = vmax.f32 %v247_v1, 0.0  ;;  %v256_v7 = vmax.f32 %v248_v2, 0.0  ;;  %v250_v9 = vld [vmem:[%s219_s23 + $0x18] sm:$0xff]  ;;  %s2433_s10 = scalar_lea.vmem %s2466_s5, %s1506_s20 }
  0x12   : > { %827 = vst.msk [vmem:[#allocation3 + $0x40] sm:$0xff] %vm609_vm2, %v1785_v0  ;;  %829 = vst.msk [vmem:[#allocation3 + $0x50] sm:$0xff] %vm609_vm2, %v1785_v0  ;;  %v257_v8 = vmax.f32 %v249_v3, 0.0  ;;  %v258_v10 = vmax.f32 %v250_v9, 0.0  ;;  %v251_v11 = vld [vmem:[%s219_s23 + $0x20] sm:$0xff]  ;;  %v252_v12 = vld [vmem:[%s219_s23 + $0x28] sm:$0xff]  ;;  %1566 = vmatpush3.bf16.msra.mxu0 %v1563_v33 }
  0x13   : > { %831 = vst.msk [vmem:[#allocation3 + $0x60] sm:$0xff] %vm609_vm2, %v1785_v0  ;;  %833 = vst.msk [vmem:[#allocation3 + $0x70] sm:$0xff] %vm609_vm2, %v1785_v0  ;;  %v259_v13 = vmax.f32 %v251_v11, 0.0  ;;  %v260_v14 = vmax.f32 %v252_v12, 0.0  ;;  %v253_v15 = vld [vmem:[%s219_s23 + $0x30] sm:$0xff]  ;;  %v254_v16 = vld [vmem:[%s219_s23 + $0x38] sm:$0xff]  ;;  %1568 = vmatprep.subr.bf16.mxu0 %v1567_v37 }
  0x14   : > { %835 = vst.msk [vmem:[#allocation3 + $0x80] sm:$0xff] %vm609_vm2, %v1785_v0  ;;  %837 = vst.msk [vmem:[#allocation3 + $0x90] sm:$0xff] %vm609_vm2, %v1785_v0  ;;  %v261_v17 = vmax.f32 %v253_v15, 0.0  ;;  %v262_v18 = vmax.f32 %v254_v16, 0.0  ;;  %vm1185_vm11 = vcmask 654336   ;;  %vm1194_vm12 = vcmask 785408  }
  0x15   : > { %264 = vst.msk [vmem:[#allocation2 + $0x11] sm:$0xff] %vm225_vm0, %v255_v6  ;;  %265 = vst.msk [vmem:[#allocation2 + $0x21] sm:$0xff] %vm225_vm0, %v256_v7  ;;  %v328_v58 = vld [vmem:[#allocation2 + $0x90] sm:$0xff]  ;;  %vm1203_vm13 = vcmask 916480  }
  0x16   : > { %266 = vst.msk [vmem:[#allocation2 + $0x31] sm:$0xff] %vm225_vm0, %v257_v8  ;;  %267 = vst.msk [vmem:[#allocation2 + $0x41] sm:$0xff] %vm225_vm0, %v258_v10  ;;  %1570 = vmatpush3.bf16.msra.mxu0 %v1567_v37  ;;  %v336_v59 = vld [vmem:[#allocation2 + $0x91] sm:$0xff]  ;;  %v272_v10 = vld [vmem:[#allocation2] sm:$0xff] }
  0x17   : > { %268 = vst.msk [vmem:[#allocation2 + $0x51] sm:$0xff] %vm225_vm0, %v259_v13  ;;  %269 = vst.msk [vmem:[#allocation2 + $0x61] sm:$0xff] %vm225_vm0, %v260_v14  ;;  %1541 = vmatprep.subr.mxu0 %v680_v39  ;;  %v344_v62 = vld [vmem:[#allocation2 + $0x92] sm:$0xff] }
  0x18   : > { %270 = vst.msk [vmem:[#allocation2 + $0x71] sm:$0xff] %vm225_vm0, %v261_v17  ;;  %271 = vst.msk [vmem:[#allocation2 + $0x81] sm:$0xff] %vm225_vm0, %v262_v18 }
  0x19   : > { %824 = vst.msk [vmem:[#allocation3 + $0x28] sm:$0x3] %vm819_vm10, %v1785_v0  ;;  %820 = vst.msk [vmem:[#allocation3 + $0x8] sm:$0x3] %vm819_vm10, %v1785_v0 }
  0x1a   : > { %1542 = vmatpush3.msra.mxu0 %v680_v39  ;;  %822 = vst.msk [vmem:[#allocation3 + $0x18] sm:$0x3] %vm819_vm10, %v1785_v0  ;;  %826 = vst.msk [vmem:[#allocation3 + $0x38] sm:$0x3] %vm819_vm10, %v1785_v0 }
  0x1b   : > { %828 = vst.msk [vmem:[#allocation3 + $0x48] sm:$0x3] %vm819_vm10, %v1785_v0  ;;  %830 = vst.msk [vmem:[#allocation3 + $0x58] sm:$0x3] %vm819_vm10, %v1785_v0 }
  0x1c   : > { %v289_v19 = vld [vmem:[#allocation2 + $0x12] sm:$0xff]  ;;  %v1920_v21 = vld [vmem:[#allocation2 + $0x20] sm:$0xff]  ;;  %832 = vst.msk [vmem:[#allocation3 + $0x68] sm:$0x3] %vm819_vm10, %v1785_v0  ;;  %834 = vst.msk [vmem:[#allocation3 + $0x78] sm:$0x3] %vm819_vm10, %v1785_v0 }
  0x1d   : > { %v281_v20 = vld [vmem:[#allocation2 + $0x11] sm:$0xff]  ;;  %387 = vrot.lane.b32.xlu1 %v289_v19, %s1786_s24  ;;  %v305_v23 = vld [vmem:[#allocation2 + $0x21] sm:$0xff]  ;;  %836 = vst.msk [vmem:[#allocation3 + $0x88] sm:$0x3] %vm819_vm10, %v1785_v0  ;;  %838 = vst.msk [vmem:[#allocation3 + $0x98] sm:$0x3] %vm819_vm10, %v1785_v0 }
  0x1e   : > { %355 = vrot.lane.b32.xlu0 %v281_v20, %s1787_s25  ;;  %v1922_v22 = vld [vmem:[#allocation2 + $0x10] sm:$0xff]  ;;  %v313_v30 = vld [vmem:[#allocation2 + $0x22] sm:$0xff] }
  0x1f   : > { %v283_v34 = vld [vmem:[#allocation2 + $0x31] sm:$0xff]  ;;  %v1974_v41 = vld [vmem:[#allocation2 + $0x40] sm:$0xff] }
  0x20   : > { %v1961_v38 = vld [vmem:[#allocation2 + $0x30] sm:$0xff]  ;;  %v307_v42 = vld [vmem:[#allocation2 + $0x41] sm:$0xff] }
  0x21   : > { %419 = vrot.lane.b32.xlu1 %v1920_v21, %s1788_s26  ;;  %v291_v40 = vld [vmem:[#allocation2 + $0x32] sm:$0xff]  ;;  %v315_v43 = vld [vmem:[#allocation2 + $0x42] sm:$0xff] }
  0x22   : > { %417 = vrot.lane.b32.xlu0 %v1922_v22, %s1788_s26  ;;  %v1983_v44 = vld [vmem:[#allocation2 + $0x50] sm:$0xff]  ;;  %v1997_v47 = vld [vmem:[#allocation2 + $0x60] sm:$0xff] }
  0x23   : > { %v332_v45 = vld [vmem:[#allocation2 + $0x51] sm:$0xff]  ;;  %v309_v48 = vld [vmem:[#allocation2 + $0x61] sm:$0xff] }
  0x24   : > { %v340_v46 = vld [vmem:[#allocation2 + $0x52] sm:$0xff]  ;;  %v317_v49 = vld [vmem:[#allocation2 + $0x62] sm:$0xff] }
  0x25   : > { %451 = vrot.lane.b32.xlu1 %v305_v23, %s1789_s6  ;;  %v2007_v50 = vld [vmem:[#allocation2 + $0x70] sm:$0xff]  ;;  %v303_v53 = vld [vmem:[#allocation2 + $0x80] sm:$0xff] }
  0x26   : > { %449 = vrot.lane.b32.xlu0 %v281_v20, %s1789_s6  ;;  %v334_v51 = vld [vmem:[#allocation2 + $0x71] sm:$0xff]  ;;  %v311_v54 = vld [vmem:[#allocation2 + $0x81] sm:$0xff] }
  0x27   : > { %v342_v52 = vld [vmem:[#allocation2 + $0x72] sm:$0xff]  ;;  %v319_v55 = vld [vmem:[#allocation2 + $0x82] sm:$0xff] }
  0x29   : > { %357 = vrot.lane.b32.xlu1 %v305_v23, %s1787_s25 }
  0x2a   : > { %481 = vrot.lane.b32.xlu0 %v289_v19, %s1790_s11 }
  0x2d   : > { %513 = vrot.lane.b32.xlu1 %v1920_v21, %s1791_s16 }
  0x2e   : > { %483 = vrot.lane.b32.xlu0 %v313_v30, %s1790_s11 }
  0x31   : > { %389 = vrot.lane.b32.xlu1 %v313_v30, %s1786_s24 }
  0x32   : > { %359 = vrot.lane.b32.xlu0 %v283_v34, %s1787_s25 }
  0x35   : > { %545 = vrot.lane.b32.xlu1 %v305_v23, %s1792_s29 }
  0x36   : > { %515 = vrot.lane.b32.xlu0 %v1961_v38, %s1791_s16 }
  0x39   : > { %421 = vrot.lane.b32.xlu1 %v1961_v38, %s1788_s26 }
  0x3a   : > { %391 = vrot.lane.b32.xlu0 %v291_v40, %s1786_s24 }
  0x3d   : > { %577 = vrot.lane.b32.xlu1 %v313_v30, %s1793_s30 }
  0x3e   : > { %547 = vrot.lane.b32.xlu0 %v283_v34, %s1792_s29 }
  0x41   : > { %453 = vrot.lane.b32.xlu1 %v283_v34, %s1789_s6 }
  0x42   : > { %423 = vrot.lane.b32.xlu0 %v1974_v41, %s1788_s26 }
  0x45   : > { %455 = vrot.lane.b32.xlu1 %v307_v42, %s1789_s6 }
  0x46   : > { %579 = vrot.lane.b32.xlu0 %v291_v40, %s1793_s30 }
  0x49   : > { %487 = vrot.lane.b32.xlu1 %v315_v43, %s1790_s11 }
  0x4a   : > { %485 = vrot.lane.b32.xlu0 %v291_v40, %s1790_s11 }
  0x4d   : > { %519 = vrot.lane.b32.xlu1 %v1983_v44, %s1791_s16 }
  0x4e   : > { %517 = vrot.lane.b32.xlu0 %v1974_v41, %s1791_s16 }
  0x51   : > { %551 = vrot.lane.b32.xlu1 %v332_v45, %s1792_s29 }
  0x52   : > { %549 = vrot.lane.b32.xlu0 %v307_v42, %s1792_s29 }
  0x55   : > { %361 = vrot.lane.b32.xlu1 %v307_v42, %s1787_s25 }
  0x56   : > { %581 = vrot.lane.b32.xlu0 %v315_v43, %s1793_s30 }
  0x59   : > { %363 = vrot.lane.b32.xlu1 %v332_v45, %s1787_s25 }
  0x5a   : > { %583 = vrot.lane.b32.xlu0 %v340_v46, %s1793_s30 }
  0x5d   : > { %395 = vrot.lane.b32.xlu1 %v340_v46, %s1786_s24 }
  0x5e   : > { %393 = vrot.lane.b32.xlu0 %v315_v43, %s1786_s24 }
  0x61   : > { %427 = vrot.lane.b32.xlu1 %v1997_v47, %s1788_s26 }
  0x62   : > { %425 = vrot.lane.b32.xlu0 %v1983_v44, %s1788_s26 }
  0x65   : > { %459 = vrot.lane.b32.xlu1 %v309_v48, %s1789_s6 }
  0x66   : > { %457 = vrot.lane.b32.xlu0 %v332_v45, %s1789_s6 }
  0x69   : > { %491 = vrot.lane.b32.xlu1 %v317_v49, %s1790_s11 }
  0x6a   : > { %489 = vrot.lane.b32.xlu0 %v340_v46, %s1790_s11 }
  0x6d   : > { %523 = vrot.lane.b32.xlu1 %v2007_v50, %s1791_s16 }
  0x6e   : > { %521 = vrot.lane.b32.xlu0 %v1997_v47, %s1791_s16 }
  0x71   : > { %555 = vrot.lane.b32.xlu1 %v334_v51, %s1792_s29 }
  0x72   : > { %553 = vrot.lane.b32.xlu0 %v309_v48, %s1792_s29 }
  0x75   : > { %365 = vrot.lane.b32.xlu1 %v309_v48, %s1787_s25 }
  0x76   : > { %585 = vrot.lane.b32.xlu0 %v317_v49, %s1793_s30 }
  0x79   : > { %367 = vrot.lane.b32.xlu1 %v334_v51, %s1787_s25 }
  0x7a   : > { %587 = vrot.lane.b32.xlu0 %v342_v52, %s1793_s30 }
  0x7d   : > { %399 = vrot.lane.b32.xlu1 %v342_v52, %s1786_s24 }
  0x7e   : > { %397 = vrot.lane.b32.xlu0 %v317_v49, %s1786_s24 }
  0x81   : > { %431 = vrot.lane.b32.xlu1 %v303_v53, %s1788_s26  ;;  %v386_v56 = vpop.permute.xlu1 %385 }
  0x82   : > { %429 = vrot.lane.b32.xlu0 %v2007_v50, %s1788_s26  ;;  %v354_v57 = vpop.permute.xlu0 %353 }
  0x83   : > { %v601_v11 = vsel %vm225_vm0, %v272_v10, %v354_v57 }
  0x84   : > { %v610_v14 = vsel %vm609_vm2, %v601_v11, %v386_v56 }
  0x85   : > { %463 = vrot.lane.b32.xlu1 %v311_v54, %s1789_s6 }
  0x86   : > { %461 = vrot.lane.b32.xlu0 %v334_v51, %s1789_s6 }
  0x89   : > { %495 = vrot.lane.b32.xlu1 %v319_v55, %s1790_s11 }
  0x8a   : > { %493 = vrot.lane.b32.xlu0 %v342_v52, %s1790_s11 }
  0x8d   : > { %527 = vrot.lane.b32.xlu1 %v328_v58, %s1791_s16 }
  0x8e   : > { %525 = vrot.lane.b32.xlu0 %v303_v53, %s1791_s16 }
  0x8f   : > { %v388_v60 = vpop.permute.xlu1 %387 }
  0x90   : > { %v356_v61 = vpop.permute.xlu0 %355 }
  0x91   : > { %559 = vrot.lane.b32.xlu1 %v336_v59, %s1792_s29  ;;  %v602_v23 = vsel %vm225_vm0, %v1922_v22, %v356_v61 }
  0x92   : > { %557 = vrot.lane.b32.xlu0 %v311_v54, %s1792_s29  ;;  %v611_v28 = vsel %vm609_vm2, %v602_v23, %v388_v60 }
  0x93   : > { %v420_v63 = vpop.permute.xlu1 %419 }
  0x94   : > { %v418_v1 = vpop.permute.xlu0 %417  ;;  %v620_v29 = vsel %vm618_vm3, %v611_v28, %v420_v63 }
  0x95   : > { %591 = vrot.lane.b32.xlu1 %v344_v62, %s1793_s30  ;;  %v619_v15 = vsel %vm618_vm3, %v610_v14, %v418_v1 }
  0x96   : > { %589 = vrot.lane.b32.xlu0 %v319_v55, %s1793_s30 }
  0x97   : > { %v452_v2 = vpop.permute.xlu1 %451 }
  0x98   : > { %v450_v3 = vpop.permute.xlu0 %449  ;;  %v629_v32 = vsel %vm627_vm4, %v620_v29, %v452_v2 }
  0x99   : > { %v628_v18 = vsel %vm627_vm4, %v619_v15, %v450_v3 }
  0x9b   : > { %v358_v4 = vpop.permute.xlu1 %357 }
  0x9c   : > { %v482_v5 = vpop.permute.xlu0 %481  ;;  %v603_v45 = vsel %vm225_vm0, %v1920_v21, %v358_v4 }
  0x9d   : > { %v637_v19 = vsel %vm636_vm5, %v628_v18, %v482_v5 }
  0x9f   : > { %v514_v6 = vpop.permute.xlu1 %513 }
  0xa0   : > { %v484_v7 = vpop.permute.xlu0 %483  ;;  %v646_v20 = vsel %vm645_vm6, %v637_v19, %v514_v6 }
  0xa1   : > { %v638_v33 = vsel %vm636_vm5, %v629_v32, %v484_v7 }
  0xa3   : > { %v390_v8 = vpop.permute.xlu1 %389 }
  0xa4   : > { %v360_v9 = vpop.permute.xlu0 %359  ;;  %v612_v46 = vsel %vm609_vm2, %v603_v45, %v390_v8 }
  0xa5   : > { %v604_v53 = vsel %vm225_vm0, %v1961_v38, %v360_v9 }
  0xa7   : > { %v546_v12 = vpop.permute.xlu1 %545 }
  0xa8   : > { %v516_v13 = vpop.permute.xlu0 %515  ;;  %v655_v24 = vsel %vm654_vm7, %v646_v20, %v546_v12 }
  0xa9   : > { %v647_v22 = vsel %vm645_vm6, %v638_v33, %v516_v13 }
  0xab   : > { %v422_v16 = vpop.permute.xlu1 %421 }
  0xac   : > { %v392_v17 = vpop.permute.xlu0 %391  ;;  %v621_v48 = vsel %vm618_vm3, %v612_v46, %v422_v16 }
  0xad   : > { %v613_v55 = vsel %vm609_vm2, %v604_v53, %v392_v17 }
  0xaf   : > { %v578_v25 = vpop.permute.xlu1 %577 }
  0xb0   : > { %v548_v26 = vpop.permute.xlu0 %547  ;;  %v664_v27 = vsel %vm663_vm8, %v655_v24, %v578_v25 }
  0xb1   : > { %1543 = vmatprep.mubr.msk.f32.mxu0 %vm688_vm9, %v664_v27  ;;  %v656_v34 = vsel %vm654_vm7, %v647_v22, %v548_v26 }
  0xb3   : > { %v454_v30 = vpop.permute.xlu1 %453 }
  0xb4   : > { %v424_v31 = vpop.permute.xlu0 %423  ;;  %v630_v52 = vsel %vm627_vm4, %v621_v48, %v454_v30 }
  0xb5   : > { %v622_v57 = vsel %vm618_vm3, %v613_v55, %v424_v31 }
  0xb7   : > { %v456_v35 = vpop.permute.xlu1 %455 }
  0xb8   : > { %v580_v36 = vpop.permute.xlu0 %579  ;;  %v631_v60 = vsel %vm627_vm4, %v622_v57, %v456_v35 }
  0xb9   : > { %v665_v37 = vsel %vm663_vm8, %v656_v34, %v580_v36 }
  0xba   : > { %1544 = vmatmul.mubr.msk.f32.vlgmr.msra.gmra.mrb[0].mxu0 %vm688_vm9, %v665_v37 }
  0xbb   : > { %v488_v39 = vpop.permute.xlu1 %487 }
  0xbc   : > { %v486_v40 = vpop.permute.xlu0 %485  ;;  %v640_v62 = vsel %vm636_vm5, %v631_v60, %v488_v39 }
  0xbd   : > { %v639_v54 = vsel %vm636_vm5, %v630_v52, %v486_v40 }
  0xbf   : > { %v520_v42 = vpop.permute.xlu1 %519 }
  0xc0   : > { %v518_v43 = vpop.permute.xlu0 %517  ;;  %v649_v38 = vsel %vm645_vm6, %v640_v62, %v520_v42 }
  0xc1   : > { %v648_v56 = vsel %vm645_vm6, %v639_v54, %v518_v43 }
  0xc3   : > { %v552_v49 = vpop.permute.xlu1 %551 }
  0xc4   : > { %v550_v51 = vpop.permute.xlu0 %549  ;;  %v658_v63 = vsel %vm654_vm7, %v649_v38, %v552_v49 }
  0xc5   : > { %v657_v21 = vsel %vm654_vm7, %v648_v56, %v550_v51 }
  0xc7   : > { %v362_v58 = vpop.permute.xlu1 %361 }
  0xc8   : > { %v582_v59 = vpop.permute.xlu0 %581  ;;  %v605_v14 = vsel %vm225_vm0, %v1974_v41, %v362_v58 }
  0xc9   : > { %v666_v61 = vsel %vm663_vm8, %v657_v21, %v582_v59 }
  0xca   : > { %1546 = vmatprep.mubr.msk.f32.mxu0 %vm688_vm9, %v666_v61 }
  0xcb   : > { %v364_v1 = vpop.permute.xlu1 %363 }
  0xcc   : > { %v584_v2 = vpop.permute.xlu0 %583  ;;  %v606_v20 = vsel %vm225_vm0, %v1983_v44, %v364_v1 }
  0xcd   : > { %v667_v3 = vsel %vm663_vm8, %v658_v63, %v584_v2 }
  0xce   : > { %1547 = vmatmul.mubr.msk.f32.gmra.mrb[2].mxu0 %vm688_vm9, %v667_v3  ;;  %v1212_v3 = vld [vmem:[%s2464_s3] sm:$0xff] }
  0xcf   : > { %v396_v4 = vpop.permute.xlu1 %395 }
  0xd0   : > { %v394_v5 = vpop.permute.xlu0 %393  ;;  %v615_v24 = vsel %vm609_vm2, %v606_v20, %v396_v4  ;;  %v1213_v4 = vld [vmem:[%s2464_s3 + $0x8] sm:$0xff]  ;;  %v1219_v20 = vld [vmem:[%s2464_s3 + $0x38] sm:$0xff] }
  0xd1   : > { %v614_v15 = vsel %vm609_vm2, %v605_v14, %v394_v5  ;;  %v1794_v5 = vmov 0.0|0.0  }
  0xd2   : > { %1598 = vmatprep.subr.bf16.mxu1 %v1794_v5  ;;  %1571 = vmatprep.subr.bf16.mxu0 %v1794_v5 }
  0xd3   : > { %v428_v6 = vpop.permute.xlu1 %427 }
  0xd4   : > { %v426_v7 = vpop.permute.xlu0 %425  ;;  %v624_v26 = vsel %vm618_vm3, %v615_v24, %v428_v6  ;;  %v1572_v6 = vpack.c.bf16 %v1213_v4, %v1212_v3  ;;  %v1220_v24 = vld [vmem:[%s2464_s3 + $0x40] sm:$0xff] }
  0xd5   : > { %v623_v16 = vsel %vm618_vm3, %v614_v15, %v426_v7  ;;  %v2134_v7 = vld [vmem:[%s2463_s2] ss:$0 sm:$0xff] }
  0xd6   : > { %1607 = vmatpush1.bf16.msra.mxu1 %v1572_v6  ;;  %1573 = vmatpush1.bf16.msra.mxu0 %v1572_v6 }
  0xd7   : > { %v460_v8 = vpop.permute.xlu1 %459  ;;  %1599 = vmatprep.subr.bf16.mxu1 %v1794_v5  ;;  %1574 = vmatprep.subr.bf16.mxu0 %v1794_v5 }
  0xd8   : > { %v458_v9 = vpop.permute.xlu0 %457  ;;  %v633_v29 = vsel %vm627_vm4, %v624_v26, %v460_v8 }
  0xd9   : > { %v632_v19 = vsel %vm627_vm4, %v623_v16, %v458_v9  ;;  %v1216_v16 = vld [vmem:[%s2464_s3 + $0x20] sm:$0xff] }
  0xdb   : > { %v492_v10 = vpop.permute.xlu1 %491 }
  0xdc   : > { %v490_v11 = vpop.permute.xlu0 %489  ;;  %v642_v31 = vsel %vm636_vm5, %v633_v29, %v492_v10  ;;  %v1214_v10 = vld [vmem:[%s2464_s3 + $0x10] sm:$0xff] }
  0xdd   : > { %v641_v23 = vsel %vm636_vm5, %v632_v19, %v490_v11  ;;  %v1215_v11 = vld [vmem:[%s2464_s3 + $0x18] sm:$0xff] }
  0xdf   : > { %v524_v12 = vpop.permute.xlu1 %523 }
  0xe0   : > { %v522_v13 = vpop.permute.xlu0 %521  ;;  %v651_v44 = vsel %vm645_vm6, %v642_v31, %v524_v12 }
  0xe1   : > { %v650_v25 = vsel %vm645_vm6, %v641_v23, %v522_v13  ;;  %v1575_v13 = vpack.c.bf16 %v1215_v11, %v1214_v10 }
  0xe3   : > { %v556_v17 = vpop.permute.xlu1 %555  ;;  %1608 = vmatpush1.bf16.msra.mxu1 %v1575_v13  ;;  %1576 = vmatpush1.bf16.msra.mxu0 %v1575_v13 }
  0xe4   : > { %v554_v18 = vpop.permute.xlu0 %553  ;;  %v660_v32 = vsel %vm654_vm7, %v651_v44, %v556_v17  ;;  %1600 = vmatprep.subr.bf16.mxu1 %v1794_v5  ;;  %v1217_v17 = vld [vmem:[%s2464_s3 + $0x28] sm:$0xff]  ;;  %1577 = vmatprep.subr.bf16.mxu0 %v1794_v5  ;;  %v1222_v44 = vld [vmem:[%s2464_s3 + $0x50] sm:$0xff] }
  0xe5   : > { %v659_v41 = vsel %vm654_vm7, %v650_v25, %v554_v18  ;;  %v1218_v18 = vld [vmem:[%s2464_s3 + $0x30] sm:$0xff]  ;;  %v1578_v19 = vpack.c.bf16 %v1217_v17, %v1216_v16  ;;  %v1221_v25 = vld [vmem:[%s2464_s3 + $0x48] sm:$0xff] }
  0xe6   : > { %v1581_v23 = vpack.c.bf16 %v1219_v20, %v1218_v18  ;;  %v1584_v29 = vpack.c.bf16 %v1221_v25, %v1220_v24 }
  0xe7   : > { %v366_v27 = vpop.permute.xlu1 %365  ;;  %1609 = vmatpush1.bf16.msra.mxu1 %v1578_v19  ;;  %1579 = vmatpush1.bf16.msra.mxu0 %v1578_v19 }
  0xe8   : > { %v586_v28 = vpop.permute.xlu0 %585  ;;  %v607_v49 = vsel %vm225_vm0, %v1997_v47, %v366_v27  ;;  %1601 = vmatprep.subr.bf16.mxu1 %v1794_v5  ;;  %1580 = vmatprep.subr.bf16.mxu0 %v1794_v5 }
  0xe9   : > { %v668_v30 = vsel %vm663_vm8, %v659_v41, %v586_v28 }
  0xea   : > { %1549 = vmatprep.mubr.msk.f32.mxu0 %vm688_vm9, %v668_v30 }
  0xeb   : > { %v368_v33 = vpop.permute.xlu1 %367  ;;  %1610 = vmatpush1.bf16.msra.mxu1 %v1581_v23  ;;  %1582 = vmatpush1.bf16.msra.mxu0 %v1581_v23 }
  0xec   : > { %v588_v22 = vpop.permute.xlu0 %587  ;;  %v608_v51 = vsel %vm225_vm0, %v2007_v50, %v368_v33  ;;  %1602 = vmatprep.subr.bf16.mxu1 %v1794_v5  ;;  %1583 = vmatprep.subr.bf16.mxu0 %v1794_v5 }
  0xed   : > { %v669_v34 = vsel %vm663_vm8, %v660_v32, %v588_v22  ;;  %v1223_v32 = vld [vmem:[%s2464_s3 + $0x58] sm:$0xff] }
  0xee   : > { %1550 = vmatmul.mubr.msk.f32.gmra.mrb[4].mxu0 %vm688_vm9, %v669_v34  ;;  %v1587_v33 = vpack.c.bf16 %v1223_v32, %v1222_v44 }
  0xef   : > { %v400_v35 = vpop.permute.xlu1 %399  ;;  %1611 = vmatpush1.bf16.msra.mxu1 %v1584_v29  ;;  %1585 = vmatpush1.bf16.msra.mxu0 %v1584_v29 }
  0xf0   : > { %v398_v36 = vpop.permute.xlu0 %397  ;;  %v617_v52 = vsel %vm609_vm2, %v608_v51, %v400_v35  ;;  %1603 = vmatprep.subr.bf16.mxu1 %v1794_v5  ;;  %1586 = vmatprep.subr.bf16.mxu0 %v1794_v5  ;;  %v1229_v51 = vld [vmem:[%s2464_s3 + $0x88] sm:$0xff] }
  0xf1   : > { %v616_v53 = vsel %vm609_vm2, %v607_v49, %v398_v36  ;;  %v1224_v36 = vld [vmem:[%s2464_s3 + $0x60] sm:$0xff] }
  0xf2   : > { %v1228_v49 = vld [vmem:[%s2464_s3 + $0x80] sm:$0xff] }
  0xf3   : > { %v432_v37 = vpop.permute.xlu1 %431  ;;  %1612 = vmatpush1.bf16.msra.mxu1 %v1587_v33  ;;  %1588 = vmatpush1.bf16.msra.mxu0 %v1587_v33 }
  0xf4   : > { %v430_v39 = vpop.permute.xlu0 %429  ;;  %v626_v54 = vsel %vm618_vm3, %v617_v52, %v432_v37  ;;  %v1225_v37 = vld [vmem:[%s2464_s3 + $0x68] sm:$0xff]  ;;  %1604 = vmatprep.subr.bf16.mxu1 %v1794_v5  ;;  %1589 = vmatprep.subr.bf16.mxu0 %v1794_v5  ;;  %v1596_v52 = vpack.c.bf16 %v1229_v51, %v1228_v49  ;;  %v920_v51 = vld [vmem:[#allocation3 + $0x91] sm:$0xff] }
  0xf5   : > { %v625_v55 = vsel %vm618_vm3, %v616_v53, %v430_v39 }
  0xf7   : > { %v464_v40 = vpop.permute.xlu1 %463 }
  0xf8   : > { %v462_v42 = vpop.permute.xlu0 %461  ;;  %v635_v21 = vsel %vm627_vm4, %v626_v54, %v464_v40  ;;  %v1590_v40 = vpack.c.bf16 %v1225_v37, %v1224_v36 }
  0xf9   : > { %v634_v58 = vsel %vm627_vm4, %v625_v55, %v462_v42 }
  0xfa   : > { %1613 = vmatpush1.bf16.msra.mxu1 %v1590_v40  ;;  %1591 = vmatpush1.bf16.msra.mxu0 %v1590_v40  ;;  %v864_v40 = vld [vmem:[#allocation3 + $0x1] sm:$0xff] }
  0xfb   : > { %v496_v43 = vpop.permute.xlu1 %495  ;;  %1605 = vmatprep.subr.bf16.mxu1 %v1794_v5  ;;  %1592 = vmatprep.subr.bf16.mxu0 %v1794_v5 }
  0xfc   : > { %v494_v45 = vpop.permute.xlu0 %493  ;;  %v644_v59 = vsel %vm636_vm5, %v635_v21, %v496_v43 }
  0xfd   : > { %v643_v47 = vsel %vm636_vm5, %v634_v58, %v494_v45  ;;  %v1226_v45 = vld [vmem:[%s2464_s3 + $0x70] sm:$0xff] }
  0xff   : > { %v528_v46 = vpop.permute.xlu1 %527 }
 0x100   : > { %v526_v48 = vpop.permute.xlu0 %525  ;;  %v653_v50 = vsel %vm645_vm6, %v644_v59, %v528_v46  ;;  %v1227_v46 = vld [vmem:[%s2464_s3 + $0x78] sm:$0xff] }
 0x101   : > { %v652_v60 = vsel %vm645_vm6, %v643_v47, %v526_v48  ;;  %v1593_v48 = vpack.c.bf16 %v1227_v46, %v1226_v45  ;;  %v872_v46 = vld [vmem:[#allocation3 + $0x2] sm:$0xff] }
 0x103   : > { %v560_v56 = vpop.permute.xlu1 %559  ;;  %1614 = vmatpush1.bf16.msra.mxu1 %v1593_v48  ;;  %1594 = vmatpush1.bf16.msra.mxu0 %v1593_v48 }
 0x104   : > { %v558_v57 = vpop.permute.xlu0 %557  ;;  %v662_v61 = vsel %vm654_vm7, %v653_v50, %v560_v56  ;;  %1606 = vmatprep.subr.bf16.mxu1 %v1794_v5  ;;  %1595 = vmatprep.subr.bf16.mxu0 %v1794_v5 }
 0x105   : > { %v661_v62 = vsel %vm654_vm7, %v652_v60, %v558_v57 }
 0x107   : > { %v592_v38 = vpop.permute.xlu1 %591  ;;  %1615 = vmatpush1.bf16.msra.mxu1 %v1596_v52  ;;  %1597 = vmatpush1.bf16.msra.mxu0 %v1596_v52  ;;  %v912_v52 = vld [vmem:[#allocation3 + $0x90] sm:$0xff] }
 0x108   : > { %v590_v63 = vpop.permute.xlu0 %589  ;;  %v671_v1 = vsel %vm663_vm8, %v662_v61, %v592_v38 }
 0x109   : > { %v670_v2 = vsel %vm663_vm8, %v661_v62, %v590_v63 }
 0x10a   : > { %1552 = vmatprep.mubr.msk.f32.mxu0 %vm688_vm9, %v670_v2 }
 0x10b   : > { %1553 = vmatmul.mubr.msk.f32.gmra.mrb[6].mxu0 %vm688_vm9, %v671_v1 }
 0x18d   : > { %v1545_v0 = vpop.f32.mrb[0].mxu0 }
 0x18e   : > { %v2139_v8 = vadd.f32 %v1545_v0, %v2134_v7  ;;  %v779_v9 = vpop.f32.mrb[1].mxu0 }
 0x18f   : > { %v2148_v12 = vadd.f32 %v2134_v7, %v779_v9 }
 0x190   : > { %v840_v14 = vmax.f32 %v2139_v8, 0.0 }
 0x191   : > { %v839_v15 = vmax.f32 %v2148_v12, 0.0 }
 0x192   : > { %849 = vst.msk [vmem:[#allocation3 + $0x21] sm:$0xff] %vm609_vm2, %v840_v14 }
 0x193   : > { %848 = vst.msk [vmem:[#allocation3 + $0x11] sm:$0xff] %vm609_vm2, %v839_v15 }
 0x199   : > { %v2176_v26 = vld [vmem:[#allocation3 + $0x22] sm:$0xff] }
 0x19a   : > { %v2178_v41 = vld [vmem:[#allocation3 + $0x21] sm:$0xff]  ;;  %1496 = vmatprep.mubr.msk.f32.mxu0 %vm609_vm2, %v2176_v26  ;;  %v2182_v27 = vld [vmem:[#allocation3 + $0x12] sm:$0xff] }
 0x19b   : > { %v2184_v28 = vld [vmem:[#allocation3 + $0x11] sm:$0xff]  ;;  %v1642_v30 = vpack.i.bf16 %v2176_v26, %v2182_v27  ;;  %v2236_v53 = vld [vmem:[#allocation3 + $0x20] sm:$0xff] }
 0x19c   : > { %v1637_v31 = vpack.i.bf16 %v2178_v41, %v2184_v28  ;;  %v880_v29 = vld [vmem:[#allocation3 + $0x10] sm:$0xff] }
 0x19d   : > { %1643 = vrot.lane.b32.xlu1 %v1642_v30, %s1789_s6 }
 0x19e   : > { %1638 = vrot.lane.b32.xlu0 %v1637_v31, %s1786_s24 }
 0x1a1   : > { %v1548_v22 = vpop.f32.mrb[2].mxu0 }
 0x1a2   : > { %v2203_v34 = vadd.f32 %v1548_v22, %v2134_v7  ;;  %v789_v35 = vpop.f32.mrb[3].mxu0 }
 0x1a3   : > { %v2212_v39 = vadd.f32 %v2134_v7, %v789_v35 }
 0x1a4   : > { %v842_v42 = vmax.f32 %v2203_v34, 0.0 }
 0x1a5   : > { %v841_v43 = vmax.f32 %v2212_v39, 0.0 }
 0x1a6   : > { %851 = vst.msk [vmem:[#allocation3 + $0x41] sm:$0xff] %vm609_vm2, %v842_v42 }
 0x1a7   : > { %850 = vst.msk [vmem:[#allocation3 + $0x31] sm:$0xff] %vm609_vm2, %v841_v43 }
 0x1ad   : > { %v2244_v58 = vld [vmem:[#allocation3 + $0x40] sm:$0xff] }
 0x1ae   : > { %v922_v54 = vld [vmem:[#allocation3 + $0x32] sm:$0xff]  ;;  %v868_v50 = vld [vmem:[#allocation3 + $0x41] sm:$0xff] }
 0x1af   : > { %v890_v55 = vld [vmem:[#allocation3 + $0x31] sm:$0xff]  ;;  %1497 = vmatprep.mubr.msk.f32.mxu1 %vm609_vm2, %v922_v54  ;;  %v1657_v47 = vpack.i.bf16 %v922_v54, %v2176_v26  ;;  %v2253_v61 = vld [vmem:[#allocation3 + $0x42] sm:$0xff] }
 0x1b0   : > { %v2238_v56 = vld [vmem:[#allocation3 + $0x30] sm:$0xff]  ;;  %v1652_v57 = vpack.i.bf16 %v890_v55, %v2178_v41  ;;  %v1672_v60 = vpack.i.bf16 %v868_v50, %v890_v55  ;;  %v1677_v62 = vpack.i.bf16 %v2253_v61, %v922_v54  ;;  %v1772_v54 = vpack.i.bf16 %v920_v51, %v2178_v41 }
 0x1b1   : > { %v1647_v21 = vpack.i.bf16 %v2238_v56, %v2236_v53  ;;  %v1662_v59 = vpack.i.bf16 %v2244_v58, %v2238_v56  ;;  %v1767_v55 = vpack.i.bf16 %v912_v52, %v2236_v53 }
 0x1b2   : > { %1653 = vrot.lane.b32.xlu1 %v1652_v57, %s1793_s30 }
 0x1b3   : > { %1648 = vrot.lane.b32.xlu0 %v1647_v21, %s1791_s16 }
 0x1b6   : > { %1663 = vrot.lane.b32.xlu1 %v1662_v59, %s1795_s7 }
 0x1b7   : > { %1658 = vrot.lane.b32.xlu0 %v1657_v47, %s1796_s8 }
 0x1ba   : > { %1673 = vrot.lane.b32.xlu1 %v1672_v60, %s1786_s24 }
 0x1bb   : > { %1668 = vrot.lane.b32.xlu0 %v1672_v60, %s1797_s9 }
 0x1bf   : > { %1678 = vrot.lane.b32.xlu0 %v1677_v62, %s1789_s6 }
 0x1c1   : > { %v1551_v38 = vpop.f32.mrb[4].mxu0 }
 0x1c2   : > { %v2260_v63 = vadd.f32 %v1551_v38, %v2134_v7  ;;  %v799_v1 = vpop.f32.mrb[5].mxu0 }
 0x1c3   : > { %v2263_v2 = vadd.f32 %v2134_v7, %v799_v1 }
 0x1c4   : > { %v844_v3 = vmax.f32 %v2260_v63, 0.0 }
 0x1c5   : > { %v843_v4 = vmax.f32 %v2263_v2, 0.0 }
 0x1c6   : > { %853 = vst.msk [vmem:[#allocation3 + $0x61] sm:$0xff] %vm609_vm2, %v844_v3 }
 0x1c7   : > { %852 = vst.msk [vmem:[#allocation3 + $0x51] sm:$0xff] %vm609_vm2, %v843_v4 }
 0x1cd   : > { %v2275_v11 = vld [vmem:[#allocation3 + $0x60] sm:$0xff] }
 0x1ce   : > { %v2269_v5 = vld [vmem:[#allocation3 + $0x50] sm:$0xff]  ;;  %v917_v15 = vld [vmem:[#allocation3 + $0x61] sm:$0xff] }
 0x1cf   : > { %v892_v6 = vld [vmem:[#allocation3 + $0x51] sm:$0xff]  ;;  %v1682_v0 = vpack.i.bf16 %v2269_v5, %v2244_v58  ;;  %v1697_v14 = vpack.i.bf16 %v2275_v11, %v2269_v5  ;;  %v2285_v17 = vld [vmem:[#allocation3 + $0x62] sm:$0xff] }
 0x1d0   : > { %v1687_v9 = vpack.i.bf16 %v892_v6, %v868_v50  ;;  %v2273_v10 = vld [vmem:[#allocation3 + $0x52] sm:$0xff]  ;;  %v1702_v16 = vpack.i.bf16 %v917_v15, %v892_v6 }
 0x1d1   : > { %1683 = vrot.lane.b32.xlu1 %v1682_v0, %s1791_s16  ;;  %v1692_v13 = vpack.i.bf16 %v2273_v10, %v2253_v61  ;;  %v1712_v18 = vpack.i.bf16 %v2285_v17, %v2273_v10 }
 0x1d2   : > { %1688 = vrot.lane.b32.xlu0 %v1687_v9, %s1793_s30 }
 0x1d5   : > { %1693 = vrot.lane.b32.xlu1 %v1692_v13, %s1796_s8 }
 0x1d6   : > { %1698 = vrot.lane.b32.xlu0 %v1697_v14, %s1795_s7 }
 0x1d9   : > { %1703 = vrot.lane.b32.xlu1 %v1702_v16, %s1797_s9 }
 0x1da   : > { %1708 = vrot.lane.b32.xlu0 %v1702_v16, %s1786_s24 }
 0x1dd   : > { %1713 = vrot.lane.b32.xlu1 %v1712_v18, %s1789_s6 }
 0x1de   : > { %v1554_v19 = vpop.f32.mrb[6].mxu0 }
 0x1df   : > { %v2293_v20 = vadd.f32 %v1554_v19, %v2134_v7  ;;  %v809_v23 = vpop.f32.mrb[7].mxu0 }
 0x1e0   : > { %v2296_v24 = vadd.f32 %v2134_v7, %v809_v23 }
 0x1e1   : > { %v846_v25 = vmax.f32 %v2293_v20, 0.0 }
 0x1e2   : > { %v845_v26 = vmax.f32 %v2296_v24, 0.0 }
 0x1e3   : > { %855 = vst.msk [vmem:[#allocation3 + $0x81] sm:$0xff] %vm609_vm2, %v846_v25 }
 0x1e4   : > { %854 = vst.msk [vmem:[#allocation3 + $0x71] sm:$0xff] %vm609_vm2, %v845_v26 }
 0x1ea   : > { %v887_v30 = vld [vmem:[#allocation3 + $0x80] sm:$0xff] }
 0x1eb   : > { %v895_v31 = vld [vmem:[#allocation3 + $0x81] sm:$0xff]  ;;  %v1717_v44 = vpack.i.bf16 %v887_v30, %v880_v29  ;;  %v894_v33 = vld [vmem:[#allocation3 + $0x71] sm:$0xff] }
 0x1ec   : > { %v1722_v32 = vpack.i.bf16 %v895_v31, %v2184_v28  ;;  %v2303_v22 = vld [vmem:[#allocation3 + $0x70] sm:$0xff]  ;;  %v1732_v7 = vpack.i.bf16 %v894_v33, %v917_v15  ;;  %v1752_v42 = vpack.i.bf16 %v894_v33, %v864_v40  ;;  %v1747_v43 = vpack.i.bf16 %v895_v31, %v894_v33  ;;  %v2318_v45 = vld [vmem:[#allocation3 + $0x82] sm:$0xff] }
 0x1ed   : > { %1718 = vrot.lane.b32.xlu1 %v1717_v44, %s1791_s16  ;;  %v1727_v35 = vpack.i.bf16 %v2303_v22, %v2275_v11  ;;  %v2309_v36 = vld [vmem:[#allocation3 + $0x72] sm:$0xff]  ;;  %v1742_v37 = vpack.i.bf16 %v887_v30, %v2303_v22  ;;  %v1757_v48 = vpack.i.bf16 %v2318_v45, %v2182_v27 }
 0x1ee   : > { %1723 = vrot.lane.b32.xlu0 %v1722_v32, %s1793_s30  ;;  %v1737_v28 = vpack.i.bf16 %v2309_v36, %v2285_v17  ;;  %v1762_v49 = vpack.i.bf16 %v2309_v36, %v872_v46 }
 0x1f1   : > { %1733 = vrot.lane.b32.xlu1 %v1732_v7, %s1793_s30 }
 0x1f2   : > { %1728 = vrot.lane.b32.xlu0 %v1727_v35, %s1791_s16 }
 0x1f5   : > { %1743 = vrot.lane.b32.xlu1 %v1742_v37, %s1795_s7 }
 0x1f6   : > { %1738 = vrot.lane.b32.xlu0 %v1737_v28, %s1796_s8 }
 0x1f9   : > { %1753 = vrot.lane.b32.xlu1 %v1752_v42, %s1786_s24 }
 0x1fa   : > { %1748 = vrot.lane.b32.xlu0 %v1747_v43, %s1797_s9 }
 0x1fd   : > { %1758 = vrot.lane.b32.xlu1 %v1757_v48, %s1796_s8 }
 0x1fe   : > { %1763 = vrot.lane.b32.xlu0 %v1762_v49, %s1789_s6 }
 0x201   : > { %1773 = vrot.lane.b32.xlu1 %v1772_v54, %s1797_s9 }
 0x202   : > { %1768 = vrot.lane.b32.xlu0 %v1767_v55, %s1795_s7 }
 0x205   : > { %1384 = vrot.lane.b32.xlu1 %v2139_v8, %s1797_s9 }
 0x206   : > { %1382 = vrot.lane.b32.xlu0 %v2148_v12, %s1797_s9 }
 0x209   : > { %1388 = vrot.lane.b32.xlu1 %v2203_v34, %s1797_s9 }
 0x20a   : > { %1386 = vrot.lane.b32.xlu0 %v2212_v39, %s1797_s9 }
 0x20d   : > { %1392 = vrot.lane.b32.xlu1 %v2260_v63, %s1797_s9 }
 0x20e   : > { %1390 = vrot.lane.b32.xlu0 %v2263_v2, %s1797_s9 }
 0x20f   : > { %v1644_v27 = vpop.permute.xlu1 %1643 }
 0x210   : > { %v1639_v41 = vpop.permute.xlu0 %1638  ;;  %v1645_v21 = vunpack.i.l.bf16 %v1644_v27  ;;  %v1646_v38 = vunpack.i.h.bf16 %v1644_v27 }
 0x211   : > { %1396 = vrot.lane.b32.xlu1 %v2293_v20, %s1797_s9  ;;  %v1640_v57 = vunpack.i.l.bf16 %v1639_v41  ;;  %v1641_v59 = vunpack.i.h.bf16 %v1639_v41 }
 0x212   : > { %1394 = vrot.lane.b32.xlu0 %v2296_v24, %s1797_s9 }
 0x213   : > { %v1154_v47 = vsel %vm609_vm2, %v880_v29, %v1640_v57  ;;  %v1155_v4 = vsel %vm609_vm2, %v2236_v53, %v1641_v59 }
 0x214   : > { %v1162_v3 = vsel %vm627_vm4, %v1154_v47, %v1645_v21  ;;  %v1163_v16 = vsel %vm627_vm4, %v1155_v4, %v1646_v38 }
 0x224   : > { %v1654_v50 = vpop.permute.xlu1 %1653 }
 0x225   : > { %v1649_v60 = vpop.permute.xlu0 %1648  ;;  %v1655_v1 = vunpack.i.l.bf16 %v1654_v50  ;;  %v1656_v15 = vunpack.i.h.bf16 %v1654_v50 }
 0x226   : > { %v1650_v62 = vunpack.i.l.bf16 %v1649_v60  ;;  %v1651_v6 = vunpack.i.h.bf16 %v1649_v60 }
 0x228   : > { %v1170_v0 = vsel %vm645_vm6, %v1162_v3, %v1650_v62  ;;  %v1664_v9 = vpop.permute.xlu1 %1663  ;;  %v1171_v23 = vsel %vm645_vm6, %v1163_v16, %v1651_v6 }
 0x229   : > { %v1659_v13 = vpop.permute.xlu0 %1658  ;;  %v1665_v18 = vunpack.i.l.bf16 %v1664_v9  ;;  %v1178_v19 = vsel %vm663_vm8, %v1170_v0, %v1655_v1  ;;  %v1666_v30 = vunpack.i.h.bf16 %v1664_v9  ;;  %v1179_v44 = vsel %vm663_vm8, %v1171_v23, %v1656_v15 }
 0x22a   : > { %v1660_v14 = vunpack.i.l.bf16 %v1659_v13  ;;  %v1661_v25 = vunpack.i.h.bf16 %v1659_v13 }
 0x22c   : > { %v1187_v26 = vsel %vm1185_vm11, %v1178_v19, %v1660_v14  ;;  %v1188_v7 = vsel %vm1185_vm11, %v1179_v44, %v1661_v25  ;;  %v1674_v28 = vpop.permute.xlu1 %1673 }
 0x22d   : > { %v1669_v53 = vpop.permute.xlu0 %1668  ;;  %v1196_v31 = vsel %vm1194_vm12, %v1187_v26, %v1665_v18  ;;  %v1197_v35 = vsel %vm1194_vm12, %v1188_v7, %v1666_v30  ;;  %v1675_v42 = vunpack.i.l.bf16 %v1674_v28  ;;  %v1676_v49 = vunpack.i.h.bf16 %v1674_v28 }
 0x22e   : > { %v1670_v29 = vunpack.i.l.bf16 %v1669_v53  ;;  %v1671_v32 = vunpack.i.h.bf16 %v1669_v53 }
 0x22f   : > { %v1156_v51 = vsel %vm609_vm2, %v2238_v56, %v1675_v42  ;;  %v1157_v21 = vsel %vm609_vm2, %v2244_v58, %v1676_v49 }
 0x230   : > { %v1205_v33 = vsel %vm1203_vm13, %v1196_v31, %v1670_v29  ;;  %v1206_v37 = vsel %vm1203_vm13, %v1197_v35, %v1671_v32 }
 0x231   : > { %1331 = vmatmul.mubr.f32.vlgmr.msra.gmra.mrb[0].mxu1 %v1205_v33  ;;  %v1679_v40 = vpop.permute.xlu0 %1678 }
 0x232   : > { %1498 = vmatprep.mubr.msk.f32.mxu1 %vm609_vm2, %v2253_v61  ;;  %v1680_v43 = vunpack.i.l.bf16 %v1679_v40  ;;  %v1681_v61 = vunpack.i.h.bf16 %v1679_v40 }
 0x234   : > { %v1164_v54 = vsel %vm627_vm4, %v1156_v51, %v1680_v43  ;;  %v1165_v47 = vsel %vm627_vm4, %v1157_v21, %v1681_v61  ;;  %v856_v21 = vld [vmem:[#allocation3] sm:$0xff] }
 0x235   : > { %1336 = vmatmul.mubr.f32.gmra.mrb[2].mxu1 %v1206_v37 }
 0x236   : > { %1499 = vmatprep.mubr.msk.f32.mxu1 %vm609_vm2, %v2273_v10 }
 0x243   : > { %v1684_v46 = vpop.permute.xlu1 %1683 }
 0x244   : > { %v1689_v48 = vpop.permute.xlu0 %1688  ;;  %v1685_v52 = vunpack.i.l.bf16 %v1684_v46  ;;  %v1686_v41 = vunpack.i.h.bf16 %v1684_v46 }
 0x245   : > { %v1690_v55 = vunpack.i.l.bf16 %v1689_v48  ;;  %v1691_v50 = vunpack.i.h.bf16 %v1689_v48 }
 0x246   : > { %v1172_v27 = vsel %vm645_vm6, %v1164_v54, %v1685_v52  ;;  %v1173_v62 = vsel %vm645_vm6, %v1165_v47, %v1686_v41 }
 0x247   : > { %v1694_v57 = vpop.permute.xlu1 %1693  ;;  %v1180_v60 = vsel %vm663_vm8, %v1172_v27, %v1690_v55  ;;  %v1181_v6 = vsel %vm663_vm8, %v1173_v62, %v1691_v50 }
 0x248   : > { %v1699_v10 = vpop.permute.xlu0 %1698  ;;  %v1695_v59 = vunpack.i.l.bf16 %v1694_v57  ;;  %v1696_v38 = vunpack.i.h.bf16 %v1694_v57 }
 0x249   : > { %v1700_v56 = vunpack.i.l.bf16 %v1699_v10  ;;  %v1701_v0 = vunpack.i.h.bf16 %v1699_v10 }
 0x24a   : > { %v1189_v1 = vsel %vm1185_vm11, %v1180_v60, %v1695_v59  ;;  %v1190_v14 = vsel %vm1185_vm11, %v1181_v6, %v1696_v38 }
 0x24b   : > { %v1704_v3 = vpop.permute.xlu1 %1703  ;;  %v1198_v9 = vsel %vm1194_vm12, %v1189_v1, %v1700_v56  ;;  %v1199_v15 = vsel %vm1194_vm12, %v1190_v14, %v1701_v0 }
 0x24c   : > { %v1705_v4 = vunpack.i.l.bf16 %v1704_v3  ;;  %v1706_v58 = vunpack.i.h.bf16 %v1704_v3  ;;  %v1709_v18 = vpop.permute.xlu0 %1708 }
 0x24d   : > { %v1710_v26 = vunpack.i.l.bf16 %v1709_v18  ;;  %v1711_v29 = vunpack.i.h.bf16 %v1709_v18 }
 0x24e   : > { %v1207_v13 = vsel %vm1203_vm13, %v1198_v9, %v1705_v4  ;;  %v1208_v16 = vsel %vm1203_vm13, %v1199_v15, %v1706_v58  ;;  %v928_v58 = vld [vmem:[#allocation3 + $0x92] sm:$0xff] }
 0x24f   : > { %1341 = vmatmul.mubr.f32.gmra.mrb[4].mxu1 %v1207_v13  ;;  %v1714_v19 = vpop.permute.xlu1 %1713  ;;  %v1159_v37 = vsel %vm609_vm2, %v2275_v11, %v1711_v29 }
 0x250   : > { %1500 = vmatprep.mubr.msk.f32.mxu1 %vm609_vm2, %v2285_v17  ;;  %v1715_v53 = vunpack.i.l.bf16 %v1714_v19  ;;  %v1158_v17 = vsel %vm609_vm2, %v2269_v5, %v1710_v26  ;;  %v1716_v44 = vunpack.i.h.bf16 %v1714_v19 }
 0x252   : > { %v1166_v33 = vsel %vm627_vm4, %v1158_v17, %v1715_v53  ;;  %v1167_v42 = vsel %vm627_vm4, %v1159_v37, %v1716_v44  ;;  %v1495_v37 = vld [vmem:[%s2465_s4] ss:$0 sm:$0xff] }
 0x253   : > { %1346 = vmatmul.mubr.f32.gmra.mrb[6].mxu1 %v1208_v16 }
 0x254   : > { %1501 = vmatprep.mubr.msk.f32.mxu1 %vm609_vm2, %v2309_v36 }
 0x25f   : > { %v1719_v23 = vpop.permute.xlu1 %1718 }
 0x260   : > { %v2386_v25 = vpop.permute.xlu0 %1723  ;;  %v1721_v62 = vunpack.i.h.bf16 %v1719_v23  ;;  %v1720_v38 = vunpack.i.l.bf16 %v1719_v23 }
 0x261   : > { %v1726_v4 = vunpack.i.h.bf16 %v2386_v25  ;;  %v1725_v13 = vunpack.i.l.bf16 %v2386_v25 }
 0x263   : > { %v1734_v30 = vpop.permute.xlu1 %1733 }
 0x264   : > { %v1729_v31 = vpop.permute.xlu0 %1728  ;;  %v1735_v7 = vunpack.i.l.bf16 %v1734_v30  ;;  %v1736_v43 = vunpack.i.h.bf16 %v1734_v30 }
 0x265   : > { %v1730_v32 = vunpack.i.l.bf16 %v1729_v31  ;;  %v1731_v35 = vunpack.i.h.bf16 %v1729_v31 }
 0x267   : > { %v1174_v36 = vsel %vm645_vm6, %v1166_v33, %v1730_v32  ;;  %v1744_v28 = vpop.permute.xlu1 %1743  ;;  %v1175_v48 = vsel %vm645_vm6, %v1167_v42, %v1731_v35 }
 0x268   : > { %v1739_v40 = vpop.permute.xlu0 %1738  ;;  %v1745_v5 = vunpack.i.l.bf16 %v1744_v28  ;;  %v1182_v49 = vsel %vm663_vm8, %v1174_v36, %v1735_v7  ;;  %v1183_v41 = vsel %vm663_vm8, %v1175_v48, %v1736_v43  ;;  %v1746_v11 = vunpack.i.h.bf16 %v1744_v28 }
 0x269   : > { %v1740_v46 = vunpack.i.l.bf16 %v1739_v40  ;;  %v1741_v51 = vunpack.i.h.bf16 %v1739_v40 }
 0x26b   : > { %v1191_v52 = vsel %vm1185_vm11, %v1182_v49, %v1740_v46  ;;  %v1754_v61 = vpop.permute.xlu1 %1753  ;;  %v1192_v50 = vsel %vm1185_vm11, %v1183_v41, %v1741_v51 }
 0x26c   : > { %v1749_v54 = vpop.permute.xlu0 %1748  ;;  %v1756_v27 = vunpack.i.h.bf16 %v1754_v61  ;;  %v1755_v57 = vunpack.i.l.bf16 %v1754_v61  ;;  %v1200_v10 = vsel %vm1194_vm12, %v1191_v52, %v1745_v5  ;;  %v1201_v9 = vsel %vm1194_vm12, %v1192_v50, %v1746_v11 }
 0x26d   : > { %v1750_v55 = vunpack.i.l.bf16 %v1749_v54  ;;  %v1751_v59 = vunpack.i.h.bf16 %v1749_v54 }
 0x26e   : > { %v1160_v6 = vsel %vm609_vm2, %v2303_v22, %v1756_v27  ;;  %v1153_v0 = vsel %vm609_vm2, %v856_v21, %v1755_v57 }
 0x26f   : > { %v1209_v47 = vsel %vm1203_vm13, %v1200_v10, %v1750_v55  ;;  %v1759_v60 = vpop.permute.xlu1 %1758  ;;  %v1210_v16 = vsel %vm1203_vm13, %v1201_v9, %v1751_v59 }
 0x270   : > { %v1764_v56 = vpop.permute.xlu0 %1763  ;;  %1351 = vmatmul.mubr.f32.gmra.mrb[8].mxu1 %v1209_v47  ;;  %v1761_v18 = vunpack.i.h.bf16 %v1759_v60 }
 0x271   : > { %v1766_v1 = vunpack.i.h.bf16 %v1764_v56  ;;  %v1765_v3 = vunpack.i.l.bf16 %v1764_v56  ;;  %1502 = vmatprep.mubr.msk.f32.mxu1 %vm609_vm2, %v2318_v45  ;;  %v1760_v45 = vunpack.i.l.bf16 %v1759_v60 }
 0x273   : > { %v1168_v14 = vsel %vm627_vm4, %v1160_v6, %v1766_v1  ;;  %v1161_v15 = vsel %vm627_vm4, %v1153_v0, %v1765_v3  ;;  %v1774_v22 = vpop.permute.xlu1 %1773 }
 0x274   : > { %v1176_v19 = vsel %vm645_vm6, %v1168_v14, %v1721_v62  ;;  %v1169_v23 = vsel %vm645_vm6, %v1161_v15, %v1720_v38  ;;  %v1769_v26 = vpop.permute.xlu0 %1768  ;;  %1356 = vmatmul.mubr.f32.gmra.mrb[10].mxu1 %v1210_v16  ;;  %v1776_v53 = vunpack.i.h.bf16 %v1774_v22  ;;  %v1775_v29 = vunpack.i.l.bf16 %v1774_v22 }
 0x275   : > { %v1771_v30 = vunpack.i.h.bf16 %v1769_v26  ;;  %v1770_v31 = vunpack.i.l.bf16 %v1769_v26  ;;  %1503 = vmatprep.mubr.msk.f32.mxu1 %vm609_vm2, %v928_v58  ;;  %v1177_v25 = vsel %vm663_vm8, %v1169_v23, %v1725_v13  ;;  %v1184_v17 = vsel %vm663_vm8, %v1176_v19, %v1726_v4 }
 0x276   : > { %v1186_v44 = vsel %vm1185_vm11, %v1177_v25, %v1760_v45  ;;  %v1193_v32 = vsel %vm1185_vm11, %v1184_v17, %v1761_v18 }
 0x277   : > { %v1195_v33 = vsel %vm1194_vm12, %v1186_v44, %v1770_v31  ;;  %v1202_v7 = vsel %vm1194_vm12, %v1193_v32, %v1771_v30  ;;  %v1385_v48 = vpop.permute.xlu1 %1384 }
 0x278   : > { %v1204_v35 = vsel %vm1203_vm13, %v1195_v33, %v1775_v29  ;;  %v1211_v36 = vsel %vm1203_vm13, %v1202_v7, %v1776_v53  ;;  %v1383_v43 = vpop.permute.xlu0 %1382 }
 0x279   : > { %1326 = vmatmul.mubr.f32.vlgmr.msra.gmra.mrb[8].mxu0 %v1204_v35  ;;  %1361 = vmatmul.mubr.f32.gmra.mrb[12].mxu1 %v1211_v36 }
 0x27b   : > { %v1389_v57 = vpop.permute.xlu1 %1388 }
 0x27c   : > { %v1387_v54 = vpop.permute.xlu0 %1386 }
 0x27f   : > { %v1393_v1 = vpop.permute.xlu1 %1392 }
 0x280   : > { %v1391_v50 = vpop.permute.xlu0 %1390 }
 0x283   : > { %v1397_v23 = vpop.permute.xlu1 %1396 }
 0x284   : > { %v1395_v9 = vpop.permute.xlu0 %1394 }
 0x304   : > { %v1332_v28 = vpop.f32.mrb[0].mxu1 }
 0x305   : > { %v1333_v40 = vadd.f32 %v1495_v37, %v1332_v28  ;;  %v1334_v42 = vpop.f32.mrb[1].mxu1 }
 0x307   : > { %v1367_v46 = vadd.f32 %v1333_v40, %v2139_v8 }
 0x308   : > { %v1337_v5 = vpop.f32.mrb[2].mxu1 }
 0x309   : > { %v1407_v49 = vadd.f32 %v1385_v48, %v1367_v46  ;;  %v1338_v51 = vadd.f32 %v1495_v37, %v1337_v5  ;;  %v1339_v52 = vpop.f32.mrb[3].mxu1 }
 0x30b   : > { %1415 = vst.msk [vmem:[%s2433_s10 + $0x8] sm:$0xff] %vm609_vm2, %v1407_v49  ;;  %v1368_v61 = vadd.f32 %v1338_v51, %v2212_v39 }
 0x30d   : > { %v1408_v8 = vadd.f32 %v1387_v54, %v1368_v61 }
 0x30f   : > { %1416 = vst.msk [vmem:[%s2433_s10 + $0x10] sm:$0xff] %vm609_vm2, %v1408_v8 }
 0x322   : > { %v1342_v55 = vpop.f32.mrb[4].mxu1 }
 0x323   : > { %v1343_v41 = vadd.f32 %v1495_v37, %v1342_v55  ;;  %v1344_v11 = vpop.f32.mrb[5].mxu1 }
 0x325   : > { %v1369_v27 = vadd.f32 %v1343_v41, %v2203_v34 }
 0x326   : > { %v1347_v10 = vpop.f32.mrb[6].mxu1 }
 0x327   : > { %v1409_v21 = vadd.f32 %v1389_v57, %v1369_v27  ;;  %v1348_v59 = vadd.f32 %v1495_v37, %v1347_v10  ;;  %v1349_v47 = vpop.f32.mrb[7].mxu1 }
 0x329   : > { %1417 = vst.msk [vmem:[%s2433_s10 + $0x18] sm:$0xff] %vm609_vm2, %v1409_v21  ;;  %v1370_v39 = vadd.f32 %v1348_v59, %v2263_v2 }
 0x32b   : > { %v1410_v60 = vadd.f32 %v1391_v50, %v1370_v39 }
 0x32d   : > { %1418 = vst.msk [vmem:[%s2433_s10 + $0x20] sm:$0xff] %vm609_vm2, %v1410_v60 }
 0x343   : > { %v1352_v56 = vpop.f32.mrb[8].mxu1 }
 0x344   : > { %v1353_v62 = vadd.f32 %v1495_v37, %v1352_v56  ;;  %v1354_v38 = vpop.f32.mrb[9].mxu1 }
 0x346   : > { %v1371_v34 = vadd.f32 %v1353_v62, %v2260_v63 }
 0x347   : > { %v1357_v3 = vpop.f32.mrb[10].mxu1 }
 0x348   : > { %v1411_v4 = vadd.f32 %v1393_v1, %v1371_v34  ;;  %v1358_v6 = vadd.f32 %v1495_v37, %v1357_v3  ;;  %v1359_v0 = vpop.f32.mrb[11].mxu1 }
 0x34a   : > { %1419 = vst.msk [vmem:[%s2433_s10 + $0x28] sm:$0xff] %vm609_vm2, %v1411_v4  ;;  %v1372_v2 = vadd.f32 %v1358_v6, %v2296_v24 }
 0x34c   : > { %v1412_v58 = vadd.f32 %v1395_v9, %v1372_v2  ;;  %v1327_v13 = vpop.f32.mrb[8].mxu0  ;;  %v1362_v14 = vpop.f32.mrb[12].mxu1 }
 0x34d   : > { %v1328_v15 = vadd.f32 %v1495_v37, %v1327_v13  ;;  %v1363_v16 = vadd.f32 %v1495_v37, %v1362_v14  ;;  %v1329_v63 = vpop.f32.mrb[9].mxu0  ;;  %v1364_v18 = vpop.f32.mrb[13].mxu1 }
 0x34e   : > { %1420 = vst.msk [vmem:[%s2433_s10 + $0x30] sm:$0xff] %vm609_vm2, %v1412_v58 }
 0x34f   : > { %v1366_v45 = vadd.f32 %v1328_v15, %v2148_v12  ;;  %v1373_v19 = vadd.f32 %v1363_v16, %v2293_v20 }
 0x351   : > { %v1406_v22 = vadd.f32 %v1383_v43, %v1366_v45  ;;  %v1413_v26 = vadd.f32 %v1397_v23, %v1373_v19 }
 0x353   : > { %1414 = vst.msk [vmem:[%s2433_s10] sm:$0xff] %vm609_vm2, %v1406_v22  ;;  %1421 = vst.msk [vmem:[%s2433_s10 + $0x38] sm:$0xff] %vm609_vm2, %v1413_v26 }
 0x354 PF: > { %s15_s18 = sadd.s32 1, %s1783_s18  }
 0x355   : > { %p12_p4 = scmp.ge.s32.totalorder %s15_s18, 4  }
 0x357   :  { %14 = sbr.rel (!%p12_p4) target bundleno = 1 (0x1), region = 74 }

</bundles_post_ra>
